<compile_context>
chip_gen: v7x
topology: tpu7x:2x2x1
jax: 0.10.0
libtpu: 0.0.40
codegen_flags: <defaults>
</compile_context>

<pallas_src>
import jax
import jax.numpy as jnp
from jax.experimental import pallas as pl
from jax.experimental.pallas import tpu as pltpu  # noqa: F401  (TPU backend target)

# ----------------------- model hyper-parameters (small) -----------------------
B = 2            # batch
S = 8            # sequence length
H = 32           # hidden size
NH = 4           # attention heads
HD = H // NH     # head dim
I = 64           # FFN intermediate size
VOCAB = 64
MAX_POS = 16
NUM_LABELS = 13
NUM_LAYERS = 2
LN_EPS = 1e-12
OUT_PAD = 128    # lane-padded classifier width (sliced to NUM_LABELS outside)
OUT_ROWS = 8     # full (8,128) output tile

# --------------------- packed parameter slab layout (rows, 128) ---------------------
# small-vector rows (biases / LayerNorm params), 1 row each:
(ROW_BQKV, ROW_BO, ROW_LN1G, ROW_LN1B, ROW_B1, ROW_B2, ROW_LN2G, ROW_LN2B) = range(8)
GROW = NUM_LAYERS * 8                                  # start of global vector rows
(ROW_EMB_LNG, ROW_EMB_LNB, ROW_BD, ROW_BOUT) = range(4)
NUM_VEC_ROWS = 24                                      # 20 used, padded to mult. of 8

# weight blocks (all row offsets are multiples of 8):
OFF_WORD = NUM_VEC_ROWS                                # word_emb  (VOCAB, H)   rows 24..87
OFF_PT = OFF_WORD + VOCAB                              # pos+type  (B*S, H)     rows 88..103
OFF_LAYER0 = OFF_PT + B * S                            # per-layer blocks start  row 104
LAYER_W_ROWS = 3 * H + I                               # wqkv(32)+wo(32)+w1(32)+w2(64) = 160
WQKV_OFF, WO_OFF, W1_OFF, W2_OFF = 0, H, 2 * H, 3 * H
OFF_WD = OFF_LAYER0 + NUM_LAYERS * LAYER_W_ROWS        # classifier dense (H,H)  row 424
OFF_WOUT = OFF_WD + H                                  # out proj (H, OUT_PAD)   row 456
SLAB_ROWS = OFF_WOUT + H                               # 488 rows -> ~250 KiB f32


# ------------------------------ in-kernel helpers ------------------------------
def _gelu_tanh(x):
    # BigBird default hidden_act is the tanh-approximated GELU ("gelu_new").
    return 0.5 * x * (1.0 + jnp.tanh(0.7978845608028654 * (x + 0.044715 * x * x * x)))


def _layernorm(x, gamma, beta):
    mu = jnp.mean(x, axis=-1, keepdims=True)
    var = jnp.mean((x - mu) * (x - mu), axis=-1, keepdims=True)
    return (x - mu) * jax.lax.rsqrt(var + LN_EPS) * gamma + beta


# --------------------------- fused forward Pallas kernel ---------------------------
def fused_forward_kernel(ids_ref, mask_ref, slab_ref, out_ref):
    # small-vector slab (biases / LN params): one (24,128) load, sliced by value
    vecs = slab_ref[0:NUM_VEC_ROWS, :]

    def vrow(r, n):                                    # (1, n) static slice
        return vecs[r:r + 1, :n]

    # ---- embeddings: one-hot gather matmul + precomputed (pos+type) block ----
    ids = ids_ref[...]                                                      # (B*S, 1) int32
    onehot = (jax.lax.broadcasted_iota(jnp.int32, (B * S, VOCAB), 1)
              == ids).astype(jnp.float32)                                   # (B*S, VOCAB)
    word_emb = slab_ref[OFF_WORD:OFF_WORD + VOCAB, 0:H]                     # (VOCAB, H)
    pos_type = slab_ref[OFF_PT:OFF_PT + B * S, 0:H]                         # (B*S, H) const
    x = jnp.dot(onehot, word_emb, preferred_element_type=jnp.float32) + pos_type
    x = _layernorm(x, vrow(GROW + ROW_EMB_LNG, H), vrow(GROW + ROW_EMB_LNB, H))

    # ---- additive attention mask, tiled head-major for the (NH*B) batch dim ----
    maskf = mask_ref[...].astype(jnp.float32)                               # (B, S)
    amask = ((1.0 - maskf) * -1e9).reshape(B, 1, S)                         # (B, 1, S)
    amask = jnp.concatenate([amask] * NH, axis=0)                           # (NH*B, 1, S)

    scale = 1.0 / (HD ** 0.5)

    # ---- encoder layers: static unroll, everything VMEM-resident ----
    for li in range(NUM_LAYERS):
        lw = OFF_LAYER0 + li * LAYER_W_ROWS
        vb = li * 8

        wqkv = slab_ref[lw + WQKV_OFF:lw + WQKV_OFF + H, 0:3 * H]           # (H, 3H)
        qkv = (jnp.dot(x, wqkv, preferred_element_type=jnp.float32)
               + vrow(vb + ROW_BQKV, 3 * H))                                # (B*S, 3H)

        # head-batched Q/K/V: (NH*B, S, HD), head-major ordering
        q2 = qkv[:, 0:H] * scale
        q_all = jnp.concatenate(
            [q2[:, h * HD:(h + 1) * HD].reshape(B, S, HD) for h in range(NH)], axis=0)
        k_all = jnp.concatenate(
            [qkv[:, H + h * HD:H + (h + 1) * HD].reshape(B, S, HD) for h in range(NH)], axis=0)
        v_all = jnp.concatenate(
            [qkv[:, 2 * H + h * HD:2 * H + (h + 1) * HD].reshape(B, S, HD)
             for h in range(NH)], axis=0)

        # one scores einsum + ONE softmax over all heads + one context einsum
        s = jnp.einsum('bqd,bkd->bqk', q_all, k_all,
                       preferred_element_type=jnp.float32) + amask          # (NH*B, S, S)
        m = jnp.max(s, axis=-1, keepdims=True)
        p = jnp.exp(s - m)
        p = p * pl.reciprocal(jnp.sum(p, axis=-1, keepdims=True), approx=False)  # exact
        ctx = jnp.einsum('bqk,bkd->bqd', p, v_all,
                         preferred_element_type=jnp.float32)                # (NH*B, S, HD)

        # output projection without a lane concat: head-batched einsum + head-sum
        ctx3 = ctx.reshape(NH, B * S, HD)                                   # free regroup
        wo_heads = slab_ref[lw + WO_OFF:lw + WO_OFF + H, 0:H].reshape(NH, HD, H)
        attn = jnp.einsum('hnd,hdo->hno', ctx3, wo_heads,
                          preferred_element_type=jnp.float32)               # (NH, B*S, H)
        attn_out = jnp.sum(attn, axis=0) + vrow(vb + ROW_BO, H)             # (B*S, H)

        # post-LN residual blocks (BERT/BigBird style)
        h1 = _layernorm(x + attn_out, vrow(vb + ROW_LN1G, H), vrow(vb + ROW_LN1B, H))
        w1 = slab_ref[lw + W1_OFF:lw + W1_OFF + H, 0:I]                     # (H, I)
        ff = _gelu_tanh(jnp.dot(h1, w1, preferred_element_type=jnp.float32)
                        + vrow(vb + ROW_B1, I))
        w2 = slab_ref[lw + W2_OFF:lw + W2_OFF + I, 0:H]                     # (I, H)
        ff2 = jnp.dot(ff, w2, preferred_element_type=jnp.float32) + vrow(vb + ROW_B2, H)
        x = _layernorm(h1 + ff2, vrow(vb + ROW_LN2G, H), vrow(vb + ROW_LN2B, H))

    # ---- [CLS] pooling: strided extract of token 0 of each sequence ----
    pooled = x.reshape(B, S, H)[:, 0, :]                                    # (B, H)

    # ---- classifier head + BBEvalModel's nn.ReLU, lane-padded to 128 columns ----
    wd = slab_ref[OFF_WD:OFF_WD + H, 0:H]
    wout = slab_ref[OFF_WOUT:OFF_WOUT + H, :]
    hcls = _gelu_tanh(jnp.dot(pooled, wd, preferred_element_type=jnp.float32)
                      + vrow(GROW + ROW_BD, H))
    logits = (jnp.dot(hcls, wout, preferred_element_type=jnp.float32)
              + vrow(GROW + ROW_BOUT, OUT_PAD))                             # (B, 128)
    relu_l = jnp.maximum(logits, 0.0)

    # single full (8,128) unmasked store: rows 0..B-1 relu(logits), B..2B-1 logits
    pad = jnp.zeros((OUT_ROWS - 2 * B, OUT_PAD), jnp.float32)
    out_ref[...] = jnp.concatenate([relu_l, logits, pad], axis=0)


# ------------------------------- parameter setup -------------------------------
def init_params(key):
    # TODO(synk): AutoModelForSequenceClassification.from_pretrained (HF checkpoint
    # load) has no Pallas equivalent; weights are synthesized deterministically.
    def nrm(k, shape):
        return 0.02 * jax.random.normal(k, shape, dtype=jnp.float32)

    keys = jax.random.split(key, 5 + 4 * NUM_LAYERS)
    ki = iter(range(len(keys)))

    word_emb = nrm(keys[next(ki)], (VOCAB, H))
    pos_emb = nrm(keys[next(ki)], (MAX_POS, H))
    type_emb = nrm(keys[next(ki)], (2, H))
    wd = nrm(keys[next(ki)], (H, H))
    wout_small = nrm(keys[next(ki)], (H, NUM_LABELS))
    wqkv = [nrm(keys[next(ki)], (H, 3 * H)) for _ in range(NUM_LAYERS)]
    wo = [nrm(keys[next(ki)], (H, H)) for _ in range(NUM_LAYERS)]
    w1 = [nrm(keys[next(ki)], (H, I)) for _ in range(NUM_LAYERS)]
    w2 = [nrm(keys[next(ki)], (I, H)) for _ in range(NUM_LAYERS)]

    slab = jnp.zeros((SLAB_ROWS, 128), jnp.float32)

    # small-vector rows: biases zero, LayerNorm gammas one (standard init)
    for li in range(NUM_LAYERS):
        slab = slab.at[li * 8 + ROW_LN1G, :H].set(1.0)
        slab = slab.at[li * 8 + ROW_LN2G, :H].set(1.0)
    slab = slab.at[GROW + ROW_EMB_LNG, :H].set(1.0)

    # embedding tables + precomputed (positional + token-type) activation block
    slab = slab.at[OFF_WORD:OFF_WORD + VOCAB, :H].set(word_emb)
    pos_type = jnp.tile(pos_emb[:S], (B, 1)) + type_emb[0][None, :]         # (B*S, H)
    slab = slab.at[OFF_PT:OFF_PT + B * S, :H].set(pos_type)

    # per-layer weights
    for li in range(NUM_LAYERS):
        base = OFF_LAYER0 + li * LAYER_W_ROWS
        slab = slab.at[base + WQKV_OFF:base + WQKV_OFF + H, :3 * H].set(wqkv[li])
        slab = slab.at[base + WO_OFF:base + WO_OFF + H, :H].set(wo[li])
        slab = slab.at[base + W1_OFF:base + W1_OFF + H, :I].set(w1[li])
        slab = slab.at[base + W2_OFF:base + W2_OFF + I, :H].set(w2[li])

    # classifier head (out-proj lane-padded to 128)
    slab = slab.at[OFF_WD:OFF_WD + H, :H].set(wd)
    slab = slab.at[OFF_WOUT:OFF_WOUT + H, :NUM_LABELS].set(wout_small)

    return {"slab": slab}


# --------------------------------- forward pass ---------------------------------
def _pallas_forward(slab, input_ids, attention_mask):
    return pl.pallas_call(
        fused_forward_kernel,
        out_shape=jax.ShapeDtypeStruct((OUT_ROWS, OUT_PAD), jnp.float32),
    )(input_ids.reshape(B * S, 1), attention_mask, slab)


@jax.jit
def _forward_eval(slab, input_ids, attention_mask):
    out = _pallas_forward(slab, input_ids, attention_mask)
    return out[0:B, :NUM_LABELS]                          # relu(logits)


@jax.jit
def _forward_train(slab, input_ids, attention_mask, labels):
    out = _pallas_forward(slab, input_ids, attention_mask)
    relu_logits = out[0:B, :NUM_LABELS]
    logits = out[B:2 * B, :NUM_LABELS]
    logp = jax.nn.log_softmax(logits, axis=-1)
    loss = -jnp.mean(jnp.take_along_axis(logp, labels[:, None], axis=-1))
    return relu_logits, loss


def bb_eval_forward(params, input_ids, attention_mask, labels=None):
    """Mirrors BBEvalModel.forward: returns relu(logits); with labels also CE loss."""
    if labels is not None:
        return _forward_train(params["slab"], input_ids, attention_mask, labels)
    return _forward_eval(params["slab"], input_ids, attention_mask)


# -------------------------------------- main --------------------------------------
if __name__ == "__main__":
    key = jax.random.PRNGKey(0)
    pkey, ikey = jax.random.split(key)
    params = init_params(pkey)

    input_ids = jax.random.randint(ikey, (B, S), 0, VOCAB, dtype=jnp.int32)
    attention_mask = jnp.ones((B, S), dtype=jnp.int32)

    out = bb_eval_forward(params, input_ids, attention_mask)   # labels=None path
    out = jax.block_until_ready(out)

    assert out.shape == (B, NUM_LABELS)
    assert bool(jnp.all(out >= 0.0))   # ReLU'd logits
    print("KERNEL_OK")
</pallas_src>

<mosaic_0001>
module attributes {stable_mosaic.version = 11 : i64} {
  func.func @fused_forward_kernel(%arg0: memref<16x1xi32, #tpu.memory_space<vmem>>, %arg1: memref<2x8xi32, #tpu.memory_space<vmem>>, %arg2: memref<488x128xf32, #tpu.memory_space<vmem>>, %arg3: memref<8x128xf32, #tpu.memory_space<vmem>>) attributes {dimension_semantics = [], scalar_prefetch = 0 : i64, scratch_operands = 0 : i64, tpu.core_type = #tpu.core_type<tc>} {
    %c0 = arith.constant 0 : index
    %c0_0 = arith.constant 0 : index
    %0 = vector.load %arg2[%c0, %c0_0] : memref<488x128xf32, #tpu.memory_space<vmem>>, vector<24x128xf32>
    %c0_1 = arith.constant 0 : index
    %c0_2 = arith.constant 0 : index
    %1 = vector.load %arg0[%c0_1, %c0_2] : memref<16x1xi32, #tpu.memory_space<vmem>>, vector<16x1xi32>
    %2 = tpu.iota {dimensions = array<i32: 1>} : vector<16x64xi32>
    %3 = vector.broadcast %1 : vector<16x1xi32> to vector<16x64xi32>
    %4 = arith.cmpi eq, %2, %3 : vector<16x64xi32>
    %5 = arith.extui %4 : vector<16x64xi1> to vector<16x64xi32>
    %6 = arith.sitofp %5 : vector<16x64xi32> to vector<16x64xf32>
    %c24 = arith.constant 24 : index
    %c0_3 = arith.constant 0 : index
    %7 = vector.load %arg2[%c24, %c0_3] : memref<488x128xf32, #tpu.memory_space<vmem>>, vector<64x32xf32>
    %c88 = arith.constant 88 : index
    %c0_4 = arith.constant 0 : index
    %8 = vector.load %arg2[%c88, %c0_4] : memref<488x128xf32, #tpu.memory_space<vmem>>, vector<16x32xf32>
    %cst = arith.constant dense<0.000000e+00> : vector<16x32xf32>
    %9 = tpu.matmul %6, %7, %cst {dimension_numbers = #tpu.dot_dimension_numbers<[1], [0], [0], [1], [0, 0, 1, 1], [], []>} : vector<16x64xf32>, vector<64x32xf32>, vector<16x32xf32> -> vector<16x32xf32>
    %10 = arith.addf %9, %8 : vector<16x32xf32>
    %11 = vector.extract_strided_slice %0 {offsets = [16, 0], sizes = [1, 32], strides = [1, 1]} : vector<24x128xf32> to vector<1x32xf32>
    %12 = vector.extract_strided_slice %0 {offsets = [17, 0], sizes = [1, 32], strides = [1, 1]} : vector<24x128xf32> to vector<1x32xf32>
    %cst_5 = arith.constant dense<0.000000e+00> : vector<16xf32>
    %13 = vector.multi_reduction <add>, %10, %cst_5 [1] : vector<16x32xf32> to vector<16xf32>
    %14 = vector.shape_cast %13 : vector<16xf32> to vector<16x1xf32>
    %cst_6 = arith.constant 3.200000e+01 : f32
    %15 = vector.broadcast %cst_6 : f32 to vector<16x1xf32>
    %16 = arith.divf %14, %15 : vector<16x1xf32>
    %17 = vector.broadcast %16 : vector<16x1xf32> to vector<16x32xf32>
    %18 = arith.subf %10, %17 : vector<16x32xf32>
    %19 = vector.broadcast %16 : vector<16x1xf32> to vector<16x32xf32>
    %20 = arith.subf %10, %19 : vector<16x32xf32>
    %21 = arith.mulf %18, %20 : vector<16x32xf32>
    %cst_7 = arith.constant dense<0.000000e+00> : vector<16xf32>
    %22 = vector.multi_reduction <add>, %21, %cst_7 [1] : vector<16x32xf32> to vector<16xf32>
    %23 = vector.shape_cast %22 : vector<16xf32> to vector<16x1xf32>
    %cst_8 = arith.constant 3.200000e+01 : f32
    %24 = vector.broadcast %cst_8 : f32 to vector<16x1xf32>
    %25 = arith.divf %23, %24 : vector<16x1xf32>
    %26 = vector.broadcast %16 : vector<16x1xf32> to vector<16x32xf32>
    %27 = arith.subf %10, %26 : vector<16x32xf32>
    %cst_9 = arith.constant 9.99999996E-13 : f32
    %28 = vector.broadcast %cst_9 : f32 to vector<16x1xf32>
    %29 = arith.addf %25, %28 : vector<16x1xf32>
    %30 = math.rsqrt %29 : vector<16x1xf32>
    %31 = vector.broadcast %30 : vector<16x1xf32> to vector<16x32xf32>
    %32 = arith.mulf %27, %31 : vector<16x32xf32>
    %33 = vector.broadcast %11 : vector<1x32xf32> to vector<16x32xf32>
    %34 = arith.mulf %32, %33 : vector<16x32xf32>
    %35 = vector.broadcast %12 : vector<1x32xf32> to vector<16x32xf32>
    %36 = arith.addf %34, %35 : vector<16x32xf32>
    %c0_10 = arith.constant 0 : index
    %c0_11 = arith.constant 0 : index
    %37 = vector.load %arg1[%c0_10, %c0_11] : memref<2x8xi32, #tpu.memory_space<vmem>>, vector<2x8xi32>
    %38 = arith.sitofp %37 : vector<2x8xi32> to vector<2x8xf32>
    %cst_12 = arith.constant 1.000000e+00 : f32
    %39 = vector.broadcast %cst_12 : f32 to vector<2x8xf32>
    %40 = arith.subf %39, %38 : vector<2x8xf32>
    %cst_13 = arith.constant -1.000000e+09 : f32
    %41 = vector.broadcast %cst_13 : f32 to vector<2x8xf32>
    %42 = arith.mulf %40, %41 : vector<2x8xf32>
    %43 = vector.shape_cast %42 : vector<2x8xf32> to vector<2x1x8xf32>
    %44 = tpu.concatenate %43, %43, %43, %43 in 0 : vector<2x1x8xf32>, vector<2x1x8xf32>, vector<2x1x8xf32>, vector<2x1x8xf32> -> vector<8x1x8xf32>
    %c104 = arith.constant 104 : index
    %c0_14 = arith.constant 0 : index
    %45 = vector.load %arg2[%c104, %c0_14] : memref<488x128xf32, #tpu.memory_space<vmem>>, vector<32x96xf32>
    %cst_15 = arith.constant dense<0.000000e+00> : vector<16x96xf32>
    %46 = tpu.matmul %36, %45, %cst_15 {dimension_numbers = #tpu.dot_dimension_numbers<[1], [0], [0], [1], [0, 0, 1, 1], [], []>} : vector<16x32xf32>, vector<32x96xf32>, vector<16x96xf32> -> vector<16x96xf32>
    %47 = vector.extract_strided_slice %0 {offsets = [0, 0], sizes = [1, 96], strides = [1, 1]} : vector<24x128xf32> to vector<1x96xf32>
    %48 = vector.broadcast %47 : vector<1x96xf32> to vector<16x96xf32>
    %49 = arith.addf %46, %48 : vector<16x96xf32>
    %50 = vector.extract_strided_slice %49 {offsets = [0, 0], sizes = [16, 32], strides = [1, 1]} : vector<16x96xf32> to vector<16x32xf32>
    %cst_16 = arith.constant 0.353553385 : f32
    %51 = vector.broadcast %cst_16 : f32 to vector<16x32xf32>
    %52 = arith.mulf %50, %51 : vector<16x32xf32>
    %53 = vector.extract_strided_slice %52 {offsets = [0, 0], sizes = [16, 8], strides = [1, 1]} : vector<16x32xf32> to vector<16x8xf32>
    %54 = vector.shape_cast %53 : vector<16x8xf32> to vector<2x8x8xf32>
    %55 = vector.extract_strided_slice %52 {offsets = [0, 8], sizes = [16, 8], strides = [1, 1]} : vector<16x32xf32> to vector<16x8xf32>
    %56 = vector.shape_cast %55 : vector<16x8xf32> to vector<2x8x8xf32>
    %57 = vector.extract_strided_slice %52 {offsets = [0, 16], sizes = [16, 8], strides = [1, 1]} : vector<16x32xf32> to vector<16x8xf32>
    %58 = vector.shape_cast %57 : vector<16x8xf32> to vector<2x8x8xf32>
    %59 = vector.extract_strided_slice %52 {offsets = [0, 24], sizes = [16, 8], strides = [1, 1]} : vector<16x32xf32> to vector<16x8xf32>
    %60 = vector.shape_cast %59 : vector<16x8xf32> to vector<2x8x8xf32>
    %61 = tpu.concatenate %54, %56, %58, %60 in 0 : vector<2x8x8xf32>, vector<2x8x8xf32>, vector<2x8x8xf32>, vector<2x8x8xf32> -> vector<8x8x8xf32>
    %62 = vector.extract_strided_slice %49 {offsets = [0, 32], sizes = [16, 8], strides = [1, 1]} : vector<16x96xf32> to vector<16x8xf32>
    %63 = vector.shape_cast %62 : vector<16x8xf32> to vector<2x8x8xf32>
    %64 = vector.extract_strided_slice %49 {offsets = [0, 40], sizes = [16, 8], strides = [1, 1]} : vector<16x96xf32> to vector<16x8xf32>
    %65 = vector.shape_cast %64 : vector<16x8xf32> to vector<2x8x8xf32>
    %66 = vector.extract_strided_slice %49 {offsets = [0, 48], sizes = [16, 8], strides = [1, 1]} : vector<16x96xf32> to vector<16x8xf32>
    %67 = vector.shape_cast %66 : vector<16x8xf32> to vector<2x8x8xf32>
    %68 = vector.extract_strided_slice %49 {offsets = [0, 56], sizes = [16, 8], strides = [1, 1]} : vector<16x96xf32> to vector<16x8xf32>
    %69 = vector.shape_cast %68 : vector<16x8xf32> to vector<2x8x8xf32>
    %70 = tpu.concatenate %63, %65, %67, %69 in 0 : vector<2x8x8xf32>, vector<2x8x8xf32>, vector<2x8x8xf32>, vector<2x8x8xf32> -> vector<8x8x8xf32>
    %71 = vector.extract_strided_slice %49 {offsets = [0, 64], sizes = [16, 8], strides = [1, 1]} : vector<16x96xf32> to vector<16x8xf32>
    %72 = vector.shape_cast %71 : vector<16x8xf32> to vector<2x8x8xf32>
    %73 = vector.extract_strided_slice %49 {offsets = [0, 72], sizes = [16, 8], strides = [1, 1]} : vector<16x96xf32> to vector<16x8xf32>
    %74 = vector.shape_cast %73 : vector<16x8xf32> to vector<2x8x8xf32>
    %75 = vector.extract_strided_slice %49 {offsets = [0, 80], sizes = [16, 8], strides = [1, 1]} : vector<16x96xf32> to vector<16x8xf32>
    %76 = vector.shape_cast %75 : vector<16x8xf32> to vector<2x8x8xf32>
    %77 = vector.extract_strided_slice %49 {offsets = [0, 88], sizes = [16, 8], strides = [1, 1]} : vector<16x96xf32> to vector<16x8xf32>
    %78 = vector.shape_cast %77 : vector<16x8xf32> to vector<2x8x8xf32>
    %79 = tpu.concatenate %72, %74, %76, %78 in 0 : vector<2x8x8xf32>, vector<2x8x8xf32>, vector<2x8x8xf32>, vector<2x8x8xf32> -> vector<8x8x8xf32>
    "tpu.trace_start"() <{level = 10 : i32, message = "bqd,bkd->bqk"}> : () -> ()
    %cst_17 = arith.constant dense<0.000000e+00> : vector<8x8x8xf32>
    %80 = tpu.matmul %61, %70, %cst_17 {dimension_numbers = #tpu.dot_dimension_numbers<[2], [2], [1], [1], [0, 0, 0, 1, 1, 1], [0], [0]>} : vector<8x8x8xf32>, vector<8x8x8xf32>, vector<8x8x8xf32> -> vector<8x8x8xf32>
    "tpu.trace_stop"() : () -> ()
    %81 = vector.broadcast %44 : vector<8x1x8xf32> to vector<8x8x8xf32>
    %82 = arith.addf %80, %81 : vector<8x8x8xf32>
    %cst_18 = arith.constant dense<0xFF800000> : vector<8x8xf32>
    %83 = vector.multi_reduction <maximumf>, %82, %cst_18 [2] : vector<8x8x8xf32> to vector<8x8xf32>
    %84 = vector.shape_cast %83 : vector<8x8xf32> to vector<8x8x1xf32>
    %85 = vector.broadcast %84 : vector<8x8x1xf32> to vector<8x8x8xf32>
    %86 = arith.subf %82, %85 : vector<8x8x8xf32>
    %87 = math.exp %86 : vector<8x8x8xf32>
    %cst_19 = arith.constant dense<0.000000e+00> : vector<8x8xf32>
    %88 = vector.multi_reduction <add>, %87, %cst_19 [2] : vector<8x8x8xf32> to vector<8x8xf32>
    %89 = vector.shape_cast %88 : vector<8x8xf32> to vector<8x8x1xf32>
    %90 = tpu.reciprocal %89 : vector<8x8x1xf32> -> vector<8x8x1xf32>
    %91 = vector.broadcast %90 : vector<8x8x1xf32> to vector<8x8x8xf32>
    %92 = arith.mulf %87, %91 : vector<8x8x8xf32>
    "tpu.trace_start"() <{level = 10 : i32, message = "bqk,bkd->bqd"}> : () -> ()
    %cst_20 = arith.constant dense<0.000000e+00> : vector<8x8x8xf32>
    %93 = tpu.matmul %92, %79, %cst_20 {dimension_numbers = #tpu.dot_dimension_numbers<[2], [1], [1], [2], [0, 0, 0, 1, 1, 2], [0], [0]>} : vector<8x8x8xf32>, vector<8x8x8xf32>, vector<8x8x8xf32> -> vector<8x8x8xf32>
    "tpu.trace_stop"() : () -> ()
    %94 = vector.shape_cast %93 : vector<8x8x8xf32> to vector<4x16x8xf32>
    %c136 = arith.constant 136 : index
    %c0_21 = arith.constant 0 : index
    %95 = vector.load %arg2[%c136, %c0_21] : memref<488x128xf32, #tpu.memory_space<vmem>>, vector<32x32xf32>
    %96 = vector.shape_cast %95 : vector<32x32xf32> to vector<4x8x32xf32>
    "tpu.trace_start"() <{level = 10 : i32, message = "hnd,hdo->hno"}> : () -> ()
    %cst_22 = arith.constant dense<0.000000e+00> : vector<4x16x32xf32>
    %97 = tpu.matmul %94, %96, %cst_22 {dimension_numbers = #tpu.dot_dimension_numbers<[2], [1], [1], [2], [0, 0, 0, 1, 1, 2], [0], [0]>} : vector<4x16x8xf32>, vector<4x8x32xf32>, vector<4x16x32xf32> -> vector<4x16x32xf32>
    "tpu.trace_stop"() : () -> ()
    %cst_23 = arith.constant dense<0.000000e+00> : vector<16x32xf32>
    %98 = vector.multi_reduction <add>, %97, %cst_23 [0] : vector<4x16x32xf32> to vector<16x32xf32>
    %99 = vector.extract_strided_slice %0 {offsets = [1, 0], sizes = [1, 32], strides = [1, 1]} : vector<24x128xf32> to vector<1x32xf32>
    %100 = vector.broadcast %99 : vector<1x32xf32> to vector<16x32xf32>
    %101 = arith.addf %98, %100 : vector<16x32xf32>
    %102 = arith.addf %36, %101 : vector<16x32xf32>
    %103 = vector.extract_strided_slice %0 {offsets = [2, 0], sizes = [1, 32], strides = [1, 1]} : vector<24x128xf32> to vector<1x32xf32>
    %104 = vector.extract_strided_slice %0 {offsets = [3, 0], sizes = [1, 32], strides = [1, 1]} : vector<24x128xf32> to vector<1x32xf32>
    %cst_24 = arith.constant dense<0.000000e+00> : vector<16xf32>
    %105 = vector.multi_reduction <add>, %102, %cst_24 [1] : vector<16x32xf32> to vector<16xf32>
    %106 = vector.shape_cast %105 : vector<16xf32> to vector<16x1xf32>
    %cst_25 = arith.constant 3.200000e+01 : f32
    %107 = vector.broadcast %cst_25 : f32 to vector<16x1xf32>
    %108 = arith.divf %106, %107 : vector<16x1xf32>
    %109 = vector.broadcast %108 : vector<16x1xf32> to vector<16x32xf32>
    %110 = arith.subf %102, %109 : vector<16x32xf32>
    %111 = vector.broadcast %108 : vector<16x1xf32> to vector<16x32xf32>
    %112 = arith.subf %102, %111 : vector<16x32xf32>
    %113 = arith.mulf %110, %112 : vector<16x32xf32>
    %cst_26 = arith.constant dense<0.000000e+00> : vector<16xf32>
    %114 = vector.multi_reduction <add>, %113, %cst_26 [1] : vector<16x32xf32> to vector<16xf32>
    %115 = vector.shape_cast %114 : vector<16xf32> to vector<16x1xf32>
    %cst_27 = arith.constant 3.200000e+01 : f32
    %116 = vector.broadcast %cst_27 : f32 to vector<16x1xf32>
    %117 = arith.divf %115, %116 : vector<16x1xf32>
    %118 = vector.broadcast %108 : vector<16x1xf32> to vector<16x32xf32>
    %119 = arith.subf %102, %118 : vector<16x32xf32>
    %cst_28 = arith.constant 9.99999996E-13 : f32
    %120 = vector.broadcast %cst_28 : f32 to vector<16x1xf32>
    %121 = arith.addf %117, %120 : vector<16x1xf32>
    %122 = math.rsqrt %121 : vector<16x1xf32>
    %123 = vector.broadcast %122 : vector<16x1xf32> to vector<16x32xf32>
    %124 = arith.mulf %119, %123 : vector<16x32xf32>
    %125 = vector.broadcast %103 : vector<1x32xf32> to vector<16x32xf32>
    %126 = arith.mulf %124, %125 : vector<16x32xf32>
    %127 = vector.broadcast %104 : vector<1x32xf32> to vector<16x32xf32>
    %128 = arith.addf %126, %127 : vector<16x32xf32>
    %c168 = arith.constant 168 : index
    %c0_29 = arith.constant 0 : index
    %129 = vector.load %arg2[%c168, %c0_29] : memref<488x128xf32, #tpu.memory_space<vmem>>, vector<32x64xf32>
    %cst_30 = arith.constant dense<0.000000e+00> : vector<16x64xf32>
    %130 = tpu.matmul %128, %129, %cst_30 {dimension_numbers = #tpu.dot_dimension_numbers<[1], [0], [0], [1], [0, 0, 1, 1], [], []>} : vector<16x32xf32>, vector<32x64xf32>, vector<16x64xf32> -> vector<16x64xf32>
    %131 = vector.extract_strided_slice %0 {offsets = [4, 0], sizes = [1, 64], strides = [1, 1]} : vector<24x128xf32> to vector<1x64xf32>
    %132 = vector.broadcast %131 : vector<1x64xf32> to vector<16x64xf32>
    %133 = arith.addf %130, %132 : vector<16x64xf32>
    %cst_31 = arith.constant 5.000000e-01 : f32
    %134 = vector.broadcast %cst_31 : f32 to vector<16x64xf32>
    %135 = arith.mulf %134, %133 : vector<16x64xf32>
    %cst_32 = arith.constant 4.471500e-02 : f32
    %136 = vector.broadcast %cst_32 : f32 to vector<16x64xf32>
    %137 = arith.mulf %136, %133 : vector<16x64xf32>
    %138 = arith.mulf %137, %133 : vector<16x64xf32>
    %139 = arith.mulf %138, %133 : vector<16x64xf32>
    %140 = arith.addf %133, %139 : vector<16x64xf32>
    %cst_33 = arith.constant 0.797884583 : f32
    %141 = vector.broadcast %cst_33 : f32 to vector<16x64xf32>
    %142 = arith.mulf %141, %140 : vector<16x64xf32>
    %143 = math.tanh %142 : vector<16x64xf32>
    %cst_34 = arith.constant 1.000000e+00 : f32
    %144 = vector.broadcast %cst_34 : f32 to vector<16x64xf32>
    %145 = arith.addf %144, %143 : vector<16x64xf32>
    %146 = arith.mulf %135, %145 : vector<16x64xf32>
    %c200 = arith.constant 200 : index
    %c0_35 = arith.constant 0 : index
    %147 = vector.load %arg2[%c200, %c0_35] : memref<488x128xf32, #tpu.memory_space<vmem>>, vector<64x32xf32>
    %cst_36 = arith.constant dense<0.000000e+00> : vector<16x32xf32>
    %148 = tpu.matmul %146, %147, %cst_36 {dimension_numbers = #tpu.dot_dimension_numbers<[1], [0], [0], [1], [0, 0, 1, 1], [], []>} : vector<16x64xf32>, vector<64x32xf32>, vector<16x32xf32> -> vector<16x32xf32>
    %149 = vector.extract_strided_slice %0 {offsets = [5, 0], sizes = [1, 32], strides = [1, 1]} : vector<24x128xf32> to vector<1x32xf32>
    %150 = vector.broadcast %149 : vector<1x32xf32> to vector<16x32xf32>
    %151 = arith.addf %148, %150 : vector<16x32xf32>
    %152 = arith.addf %128, %151 : vector<16x32xf32>
    %153 = vector.extract_strided_slice %0 {offsets = [6, 0], sizes = [1, 32], strides = [1, 1]} : vector<24x128xf32> to vector<1x32xf32>
    %154 = vector.extract_strided_slice %0 {offsets = [7, 0], sizes = [1, 32], strides = [1, 1]} : vector<24x128xf32> to vector<1x32xf32>
    %cst_37 = arith.constant dense<0.000000e+00> : vector<16xf32>
    %155 = vector.multi_reduction <add>, %152, %cst_37 [1] : vector<16x32xf32> to vector<16xf32>
    %156 = vector.shape_cast %155 : vector<16xf32> to vector<16x1xf32>
    %cst_38 = arith.constant 3.200000e+01 : f32
    %157 = vector.broadcast %cst_38 : f32 to vector<16x1xf32>
    %158 = arith.divf %156, %157 : vector<16x1xf32>
    %159 = vector.broadcast %158 : vector<16x1xf32> to vector<16x32xf32>
    %160 = arith.subf %152, %159 : vector<16x32xf32>
    %161 = vector.broadcast %158 : vector<16x1xf32> to vector<16x32xf32>
    %162 = arith.subf %152, %161 : vector<16x32xf32>
    %163 = arith.mulf %160, %162 : vector<16x32xf32>
    %cst_39 = arith.constant dense<0.000000e+00> : vector<16xf32>
    %164 = vector.multi_reduction <add>, %163, %cst_39 [1] : vector<16x32xf32> to vector<16xf32>
    %165 = vector.shape_cast %164 : vector<16xf32> to vector<16x1xf32>
    %cst_40 = arith.constant 3.200000e+01 : f32
    %166 = vector.broadcast %cst_40 : f32 to vector<16x1xf32>
    %167 = arith.divf %165, %166 : vector<16x1xf32>
    %168 = vector.broadcast %158 : vector<16x1xf32> to vector<16x32xf32>
    %169 = arith.subf %152, %168 : vector<16x32xf32>
    %cst_41 = arith.constant 9.99999996E-13 : f32
    %170 = vector.broadcast %cst_41 : f32 to vector<16x1xf32>
    %171 = arith.addf %167, %170 : vector<16x1xf32>
    %172 = math.rsqrt %171 : vector<16x1xf32>
    %173 = vector.broadcast %172 : vector<16x1xf32> to vector<16x32xf32>
    %174 = arith.mulf %169, %173 : vector<16x32xf32>
    %175 = vector.broadcast %153 : vector<1x32xf32> to vector<16x32xf32>
    %176 = arith.mulf %174, %175 : vector<16x32xf32>
    %177 = vector.broadcast %154 : vector<1x32xf32> to vector<16x32xf32>
    %178 = arith.addf %176, %177 : vector<16x32xf32>
    %c264 = arith.constant 264 : index
    %c0_42 = arith.constant 0 : index
    %179 = vector.load %arg2[%c264, %c0_42] : memref<488x128xf32, #tpu.memory_space<vmem>>, vector<32x96xf32>
    %cst_43 = arith.constant dense<0.000000e+00> : vector<16x96xf32>
    %180 = tpu.matmul %178, %179, %cst_43 {dimension_numbers = #tpu.dot_dimension_numbers<[1], [0], [0], [1], [0, 0, 1, 1], [], []>} : vector<16x32xf32>, vector<32x96xf32>, vector<16x96xf32> -> vector<16x96xf32>
    %181 = vector.extract_strided_slice %0 {offsets = [8, 0], sizes = [1, 96], strides = [1, 1]} : vector<24x128xf32> to vector<1x96xf32>
    %182 = vector.broadcast %181 : vector<1x96xf32> to vector<16x96xf32>
    %183 = arith.addf %180, %182 : vector<16x96xf32>
    %184 = vector.extract_strided_slice %183 {offsets = [0, 0], sizes = [16, 32], strides = [1, 1]} : vector<16x96xf32> to vector<16x32xf32>
    %cst_44 = arith.constant 0.353553385 : f32
    %185 = vector.broadcast %cst_44 : f32 to vector<16x32xf32>
    %186 = arith.mulf %184, %185 : vector<16x32xf32>
    %187 = vector.extract_strided_slice %186 {offsets = [0, 0], sizes = [16, 8], strides = [1, 1]} : vector<16x32xf32> to vector<16x8xf32>
    %188 = vector.shape_cast %187 : vector<16x8xf32> to vector<2x8x8xf32>
    %189 = vector.extract_strided_slice %186 {offsets = [0, 8], sizes = [16, 8], strides = [1, 1]} : vector<16x32xf32> to vector<16x8xf32>
    %190 = vector.shape_cast %189 : vector<16x8xf32> to vector<2x8x8xf32>
    %191 = vector.extract_strided_slice %186 {offsets = [0, 16], sizes = [16, 8], strides = [1, 1]} : vector<16x32xf32> to vector<16x8xf32>
    %192 = vector.shape_cast %191 : vector<16x8xf32> to vector<2x8x8xf32>
    %193 = vector.extract_strided_slice %186 {offsets = [0, 24], sizes = [16, 8], strides = [1, 1]} : vector<16x32xf32> to vector<16x8xf32>
    %194 = vector.shape_cast %193 : vector<16x8xf32> to vector<2x8x8xf32>
    %195 = tpu.concatenate %188, %190, %192, %194 in 0 : vector<2x8x8xf32>, vector<2x8x8xf32>, vector<2x8x8xf32>, vector<2x8x8xf32> -> vector<8x8x8xf32>
    %196 = vector.extract_strided_slice %183 {offsets = [0, 32], sizes = [16, 8], strides = [1, 1]} : vector<16x96xf32> to vector<16x8xf32>
    %197 = vector.shape_cast %196 : vector<16x8xf32> to vector<2x8x8xf32>
    %198 = vector.extract_strided_slice %183 {offsets = [0, 40], sizes = [16, 8], strides = [1, 1]} : vector<16x96xf32> to vector<16x8xf32>
    %199 = vector.shape_cast %198 : vector<16x8xf32> to vector<2x8x8xf32>
    %200 = vector.extract_strided_slice %183 {offsets = [0, 48], sizes = [16, 8], strides = [1, 1]} : vector<16x96xf32> to vector<16x8xf32>
    %201 = vector.shape_cast %200 : vector<16x8xf32> to vector<2x8x8xf32>
    %202 = vector.extract_strided_slice %183 {offsets = [0, 56], sizes = [16, 8], strides = [1, 1]} : vector<16x96xf32> to vector<16x8xf32>
    %203 = vector.shape_cast %202 : vector<16x8xf32> to vector<2x8x8xf32>
    %204 = tpu.concatenate %197, %199, %201, %203 in 0 : vector<2x8x8xf32>, vector<2x8x8xf32>, vector<2x8x8xf32>, vector<2x8x8xf32> -> vector<8x8x8xf32>
    %205 = vector.extract_strided_slice %183 {offsets = [0, 64], sizes = [16, 8], strides = [1, 1]} : vector<16x96xf32> to vector<16x8xf32>
    %206 = vector.shape_cast %205 : vector<16x8xf32> to vector<2x8x8xf32>
    %207 = vector.extract_strided_slice %183 {offsets = [0, 72], sizes = [16, 8], strides = [1, 1]} : vector<16x96xf32> to vector<16x8xf32>
    %208 = vector.shape_cast %207 : vector<16x8xf32> to vector<2x8x8xf32>
    %209 = vector.extract_strided_slice %183 {offsets = [0, 80], sizes = [16, 8], strides = [1, 1]} : vector<16x96xf32> to vector<16x8xf32>
    %210 = vector.shape_cast %209 : vector<16x8xf32> to vector<2x8x8xf32>
    %211 = vector.extract_strided_slice %183 {offsets = [0, 88], sizes = [16, 8], strides = [1, 1]} : vector<16x96xf32> to vector<16x8xf32>
    %212 = vector.shape_cast %211 : vector<16x8xf32> to vector<2x8x8xf32>
    %213 = tpu.concatenate %206, %208, %210, %212 in 0 : vector<2x8x8xf32>, vector<2x8x8xf32>, vector<2x8x8xf32>, vector<2x8x8xf32> -> vector<8x8x8xf32>
    "tpu.trace_start"() <{level = 10 : i32, message = "bqd,bkd->bqk"}> : () -> ()
    %cst_45 = arith.constant dense<0.000000e+00> : vector<8x8x8xf32>
    %214 = tpu.matmul %195, %204, %cst_45 {dimension_numbers = #tpu.dot_dimension_numbers<[2], [2], [1], [1], [0, 0, 0, 1, 1, 1], [0], [0]>} : vector<8x8x8xf32>, vector<8x8x8xf32>, vector<8x8x8xf32> -> vector<8x8x8xf32>
    "tpu.trace_stop"() : () -> ()
    %215 = vector.broadcast %44 : vector<8x1x8xf32> to vector<8x8x8xf32>
    %216 = arith.addf %214, %215 : vector<8x8x8xf32>
    %cst_46 = arith.constant dense<0xFF800000> : vector<8x8xf32>
    %217 = vector.multi_reduction <maximumf>, %216, %cst_46 [2] : vector<8x8x8xf32> to vector<8x8xf32>
    %218 = vector.shape_cast %217 : vector<8x8xf32> to vector<8x8x1xf32>
    %219 = vector.broadcast %218 : vector<8x8x1xf32> to vector<8x8x8xf32>
    %220 = arith.subf %216, %219 : vector<8x8x8xf32>
    %221 = math.exp %220 : vector<8x8x8xf32>
    %cst_47 = arith.constant dense<0.000000e+00> : vector<8x8xf32>
    %222 = vector.multi_reduction <add>, %221, %cst_47 [2] : vector<8x8x8xf32> to vector<8x8xf32>
    %223 = vector.shape_cast %222 : vector<8x8xf32> to vector<8x8x1xf32>
    %224 = tpu.reciprocal %223 : vector<8x8x1xf32> -> vector<8x8x1xf32>
    %225 = vector.broadcast %224 : vector<8x8x1xf32> to vector<8x8x8xf32>
    %226 = arith.mulf %221, %225 : vector<8x8x8xf32>
    "tpu.trace_start"() <{level = 10 : i32, message = "bqk,bkd->bqd"}> : () -> ()
    %cst_48 = arith.constant dense<0.000000e+00> : vector<8x8x8xf32>
    %227 = tpu.matmul %226, %213, %cst_48 {dimension_numbers = #tpu.dot_dimension_numbers<[2], [1], [1], [2], [0, 0, 0, 1, 1, 2], [0], [0]>} : vector<8x8x8xf32>, vector<8x8x8xf32>, vector<8x8x8xf32> -> vector<8x8x8xf32>
    "tpu.trace_stop"() : () -> ()
    %228 = vector.shape_cast %227 : vector<8x8x8xf32> to vector<4x16x8xf32>
    %c296 = arith.constant 296 : index
    %c0_49 = arith.constant 0 : index
    %229 = vector.load %arg2[%c296, %c0_49] : memref<488x128xf32, #tpu.memory_space<vmem>>, vector<32x32xf32>
    %230 = vector.shape_cast %229 : vector<32x32xf32> to vector<4x8x32xf32>
    "tpu.trace_start"() <{level = 10 : i32, message = "hnd,hdo->hno"}> : () -> ()
    %cst_50 = arith.constant dense<0.000000e+00> : vector<4x16x32xf32>
    %231 = tpu.matmul %228, %230, %cst_50 {dimension_numbers = #tpu.dot_dimension_numbers<[2], [1], [1], [2], [0, 0, 0, 1, 1, 2], [0], [0]>} : vector<4x16x8xf32>, vector<4x8x32xf32>, vector<4x16x32xf32> -> vector<4x16x32xf32>
    "tpu.trace_stop"() : () -> ()
    %cst_51 = arith.constant dense<0.000000e+00> : vector<16x32xf32>
    %232 = vector.multi_reduction <add>, %231, %cst_51 [0] : vector<4x16x32xf32> to vector<16x32xf32>
    %233 = vector.extract_strided_slice %0 {offsets = [9, 0], sizes = [1, 32], strides = [1, 1]} : vector<24x128xf32> to vector<1x32xf32>
    %234 = vector.broadcast %233 : vector<1x32xf32> to vector<16x32xf32>
    %235 = arith.addf %232, %234 : vector<16x32xf32>
    %236 = arith.addf %178, %235 : vector<16x32xf32>
    %237 = vector.extract_strided_slice %0 {offsets = [10, 0], sizes = [1, 32], strides = [1, 1]} : vector<24x128xf32> to vector<1x32xf32>
    %238 = vector.extract_strided_slice %0 {offsets = [11, 0], sizes = [1, 32], strides = [1, 1]} : vector<24x128xf32> to vector<1x32xf32>
    %cst_52 = arith.constant dense<0.000000e+00> : vector<16xf32>
    %239 = vector.multi_reduction <add>, %236, %cst_52 [1] : vector<16x32xf32> to vector<16xf32>
    %240 = vector.shape_cast %239 : vector<16xf32> to vector<16x1xf32>
    %cst_53 = arith.constant 3.200000e+01 : f32
    %241 = vector.broadcast %cst_53 : f32 to vector<16x1xf32>
    %242 = arith.divf %240, %241 : vector<16x1xf32>
    %243 = vector.broadcast %242 : vector<16x1xf32> to vector<16x32xf32>
    %244 = arith.subf %236, %243 : vector<16x32xf32>
    %245 = vector.broadcast %242 : vector<16x1xf32> to vector<16x32xf32>
    %246 = arith.subf %236, %245 : vector<16x32xf32>
    %247 = arith.mulf %244, %246 : vector<16x32xf32>
    %cst_54 = arith.constant dense<0.000000e+00> : vector<16xf32>
    %248 = vector.multi_reduction <add>, %247, %cst_54 [1] : vector<16x32xf32> to vector<16xf32>
    %249 = vector.shape_cast %248 : vector<16xf32> to vector<16x1xf32>
    %cst_55 = arith.constant 3.200000e+01 : f32
    %250 = vector.broadcast %cst_55 : f32 to vector<16x1xf32>
    %251 = arith.divf %249, %250 : vector<16x1xf32>
    %252 = vector.broadcast %242 : vector<16x1xf32> to vector<16x32xf32>
    %253 = arith.subf %236, %252 : vector<16x32xf32>
    %cst_56 = arith.constant 9.99999996E-13 : f32
    %254 = vector.broadcast %cst_56 : f32 to vector<16x1xf32>
    %255 = arith.addf %251, %254 : vector<16x1xf32>
    %256 = math.rsqrt %255 : vector<16x1xf32>
    %257 = vector.broadcast %256 : vector<16x1xf32> to vector<16x32xf32>
    %258 = arith.mulf %253, %257 : vector<16x32xf32>
    %259 = vector.broadcast %237 : vector<1x32xf32> to vector<16x32xf32>
    %260 = arith.mulf %258, %259 : vector<16x32xf32>
    %261 = vector.broadcast %238 : vector<1x32xf32> to vector<16x32xf32>
    %262 = arith.addf %260, %261 : vector<16x32xf32>
    %c328 = arith.constant 328 : index
    %c0_57 = arith.constant 0 : index
    %263 = vector.load %arg2[%c328, %c0_57] : memref<488x128xf32, #tpu.memory_space<vmem>>, vector<32x64xf32>
    %cst_58 = arith.constant dense<0.000000e+00> : vector<16x64xf32>
    %264 = tpu.matmul %262, %263, %cst_58 {dimension_numbers = #tpu.dot_dimension_numbers<[1], [0], [0], [1], [0, 0, 1, 1], [], []>} : vector<16x32xf32>, vector<32x64xf32>, vector<16x64xf32> -> vector<16x64xf32>
    %265 = vector.extract_strided_slice %0 {offsets = [12, 0], sizes = [1, 64], strides = [1, 1]} : vector<24x128xf32> to vector<1x64xf32>
    %266 = vector.broadcast %265 : vector<1x64xf32> to vector<16x64xf32>
    %267 = arith.addf %264, %266 : vector<16x64xf32>
    %cst_59 = arith.constant 5.000000e-01 : f32
    %268 = vector.broadcast %cst_59 : f32 to vector<16x64xf32>
    %269 = arith.mulf %268, %267 : vector<16x64xf32>
    %cst_60 = arith.constant 4.471500e-02 : f32
    %270 = vector.broadcast %cst_60 : f32 to vector<16x64xf32>
    %271 = arith.mulf %270, %267 : vector<16x64xf32>
    %272 = arith.mulf %271, %267 : vector<16x64xf32>
    %273 = arith.mulf %272, %267 : vector<16x64xf32>
    %274 = arith.addf %267, %273 : vector<16x64xf32>
    %cst_61 = arith.constant 0.797884583 : f32
    %275 = vector.broadcast %cst_61 : f32 to vector<16x64xf32>
    %276 = arith.mulf %275, %274 : vector<16x64xf32>
    %277 = math.tanh %276 : vector<16x64xf32>
    %cst_62 = arith.constant 1.000000e+00 : f32
    %278 = vector.broadcast %cst_62 : f32 to vector<16x64xf32>
    %279 = arith.addf %278, %277 : vector<16x64xf32>
    %280 = arith.mulf %269, %279 : vector<16x64xf32>
    %c360 = arith.constant 360 : index
    %c0_63 = arith.constant 0 : index
    %281 = vector.load %arg2[%c360, %c0_63] : memref<488x128xf32, #tpu.memory_space<vmem>>, vector<64x32xf32>
    %cst_64 = arith.constant dense<0.000000e+00> : vector<16x32xf32>
    %282 = tpu.matmul %280, %281, %cst_64 {dimension_numbers = #tpu.dot_dimension_numbers<[1], [0], [0], [1], [0, 0, 1, 1], [], []>} : vector<16x64xf32>, vector<64x32xf32>, vector<16x32xf32> -> vector<16x32xf32>
    %283 = vector.extract_strided_slice %0 {offsets = [13, 0], sizes = [1, 32], strides = [1, 1]} : vector<24x128xf32> to vector<1x32xf32>
    %284 = vector.broadcast %283 : vector<1x32xf32> to vector<16x32xf32>
    %285 = arith.addf %282, %284 : vector<16x32xf32>
    %286 = arith.addf %262, %285 : vector<16x32xf32>
    %287 = vector.extract_strided_slice %0 {offsets = [14, 0], sizes = [1, 32], strides = [1, 1]} : vector<24x128xf32> to vector<1x32xf32>
    %288 = vector.extract_strided_slice %0 {offsets = [15, 0], sizes = [1, 32], strides = [1, 1]} : vector<24x128xf32> to vector<1x32xf32>
    %cst_65 = arith.constant dense<0.000000e+00> : vector<16xf32>
    %289 = vector.multi_reduction <add>, %286, %cst_65 [1] : vector<16x32xf32> to vector<16xf32>
    %290 = vector.shape_cast %289 : vector<16xf32> to vector<16x1xf32>
    %cst_66 = arith.constant 3.200000e+01 : f32
    %291 = vector.broadcast %cst_66 : f32 to vector<16x1xf32>
    %292 = arith.divf %290, %291 : vector<16x1xf32>
    %293 = vector.broadcast %292 : vector<16x1xf32> to vector<16x32xf32>
    %294 = arith.subf %286, %293 : vector<16x32xf32>
    %295 = vector.broadcast %292 : vector<16x1xf32> to vector<16x32xf32>
    %296 = arith.subf %286, %295 : vector<16x32xf32>
    %297 = arith.mulf %294, %296 : vector<16x32xf32>
    %cst_67 = arith.constant dense<0.000000e+00> : vector<16xf32>
    %298 = vector.multi_reduction <add>, %297, %cst_67 [1] : vector<16x32xf32> to vector<16xf32>
    %299 = vector.shape_cast %298 : vector<16xf32> to vector<16x1xf32>
    %cst_68 = arith.constant 3.200000e+01 : f32
    %300 = vector.broadcast %cst_68 : f32 to vector<16x1xf32>
    %301 = arith.divf %299, %300 : vector<16x1xf32>
    %302 = vector.broadcast %292 : vector<16x1xf32> to vector<16x32xf32>
    %303 = arith.subf %286, %302 : vector<16x32xf32>
    %cst_69 = arith.constant 9.99999996E-13 : f32
    %304 = vector.broadcast %cst_69 : f32 to vector<16x1xf32>
    %305 = arith.addf %301, %304 : vector<16x1xf32>
    %306 = math.rsqrt %305 : vector<16x1xf32>
    %307 = vector.broadcast %306 : vector<16x1xf32> to vector<16x32xf32>
    %308 = arith.mulf %303, %307 : vector<16x32xf32>
    %309 = vector.broadcast %287 : vector<1x32xf32> to vector<16x32xf32>
    %310 = arith.mulf %308, %309 : vector<16x32xf32>
    %311 = vector.broadcast %288 : vector<1x32xf32> to vector<16x32xf32>
    %312 = arith.addf %310, %311 : vector<16x32xf32>
    %313 = vector.shape_cast %312 : vector<16x32xf32> to vector<2x8x32xf32>
    %314 = vector.extract_strided_slice %313 {offsets = [0, 0, 0], sizes = [2, 1, 32], strides = [1, 1, 1]} : vector<2x8x32xf32> to vector<2x1x32xf32>
    %315 = vector.shape_cast %314 : vector<2x1x32xf32> to vector<2x32xf32>
    %c424 = arith.constant 424 : index
    %c0_70 = arith.constant 0 : index
    %316 = vector.load %arg2[%c424, %c0_70] : memref<488x128xf32, #tpu.memory_space<vmem>>, vector<32x32xf32>
    %c456 = arith.constant 456 : index
    %c0_71 = arith.constant 0 : index
    %317 = vector.load %arg2[%c456, %c0_71] : memref<488x128xf32, #tpu.memory_space<vmem>>, vector<32x128xf32>
    %cst_72 = arith.constant dense<0.000000e+00> : vector<2x32xf32>
    %318 = tpu.matmul %315, %316, %cst_72 {dimension_numbers = #tpu.dot_dimension_numbers<[1], [0], [0], [1], [0, 0, 1, 1], [], []>} : vector<2x32xf32>, vector<32x32xf32>, vector<2x32xf32> -> vector<2x32xf32>
    %319 = vector.extract_strided_slice %0 {offsets = [18, 0], sizes = [1, 32], strides = [1, 1]} : vector<24x128xf32> to vector<1x32xf32>
    %320 = vector.broadcast %319 : vector<1x32xf32> to vector<2x32xf32>
    %321 = arith.addf %318, %320 : vector<2x32xf32>
    %cst_73 = arith.constant 5.000000e-01 : f32
    %322 = vector.broadcast %cst_73 : f32 to vector<2x32xf32>
    %323 = arith.mulf %322, %321 : vector<2x32xf32>
    %cst_74 = arith.constant 4.471500e-02 : f32
    %324 = vector.broadcast %cst_74 : f32 to vector<2x32xf32>
    %325 = arith.mulf %324, %321 : vector<2x32xf32>
    %326 = arith.mulf %325, %321 : vector<2x32xf32>
    %327 = arith.mulf %326, %321 : vector<2x32xf32>
    %328 = arith.addf %321, %327 : vector<2x32xf32>
    %cst_75 = arith.constant 0.797884583 : f32
    %329 = vector.broadcast %cst_75 : f32 to vector<2x32xf32>
    %330 = arith.mulf %329, %328 : vector<2x32xf32>
    %331 = math.tanh %330 : vector<2x32xf32>
    %cst_76 = arith.constant 1.000000e+00 : f32
    %332 = vector.broadcast %cst_76 : f32 to vector<2x32xf32>
    %333 = arith.addf %332, %331 : vector<2x32xf32>
    %334 = arith.mulf %323, %333 : vector<2x32xf32>
    %cst_77 = arith.constant dense<0.000000e+00> : vector<2x128xf32>
    %335 = tpu.matmul %334, %317, %cst_77 {dimension_numbers = #tpu.dot_dimension_numbers<[1], [0], [0], [1], [0, 0, 1, 1], [], []>} : vector<2x32xf32>, vector<32x128xf32>, vector<2x128xf32> -> vector<2x128xf32>
    %336 = vector.extract_strided_slice %0 {offsets = [19, 0], sizes = [1, 128], strides = [1, 1]} : vector<24x128xf32> to vector<1x128xf32>
    %337 = vector.broadcast %336 : vector<1x128xf32> to vector<2x128xf32>
    %338 = arith.addf %335, %337 : vector<2x128xf32>
    %cst_78 = arith.constant 0.000000e+00 : f32
    %339 = vector.broadcast %cst_78 : f32 to vector<2x128xf32>
    %340 = arith.maximumf %338, %339 : vector<2x128xf32>
    %cst_79 = arith.constant 0.000000e+00 : f32
    %341 = vector.broadcast %cst_79 : f32 to vector<4x128xf32>
    %342 = tpu.concatenate %340, %338, %341 in 0 : vector<2x128xf32>, vector<2x128xf32>, vector<4x128xf32> -> vector<8x128xf32>
    %c0_80 = arith.constant 0 : index
    %c0_81 = arith.constant 0 : index
    %343 = vector.load %arg3[%c0_80, %c0_81] : memref<8x128xf32, #tpu.memory_space<vmem>>, vector<8x128xf32>
    tpu.vector_store %arg3[%c0_80, %c0_81], %342 {strides = array<i32>} : memref<8x128xf32, #tpu.memory_space<vmem>>, vector<8x128xf32>,
    return
  }
}

</mosaic_0001>

<bundles_post_ra>
// kernel: _forward_eval.1
= control target key start
LH: loop header
LB: loop body
LE: loop exit
PB: predicated region body
PF: predicated region fallthrough
CT: control target
= control target key end

     0   :  { %8 = vsyncpa [#allocation3], 0  ;;  %s5290_s12 = smov [#allocation2]   ;;  %s5866_s0 = inlined_call_operand.vmem [shape: s32[16,1], index: 0, kind: input, shape index: {}]   ;;  %s5867_s1 = inlined_call_operand.vmem [shape: s32[2,8], index: 1, kind: input, shape index: {}]   ;;  %s5868_s2 = inlined_call_operand.hbm [shape: f32[488,128], index: 2, kind: input, shape index: {}]   ;;  %s5869_s3 = inlined_call_operand.vmem [shape: f32[8,128], index: 3, kind: output, shape index: {}]  }
   0x1   :  { %s18_s13 = sshll.u32 %s5290_s12, 4  ;;  %s5266_s16 = scalar_lea.hbm %s5868_s2, 7808  ;;  %s19_s13 = int_to_ptr.vmem [resolvable:$true] %s18_s13 }
   0x2   :  { %p5267_p0 = scmp.ne.s32.totalorder %s5868_s2, %s5266_s16  ;;  %p5270_p1 = scmp.lt.u32.totalorder %s5266_s16, %s5868_s2 }
   0x4   :  { %p5272_p2 = pnand %p5270_p1, %p5267_p0 }
   0x6   :  { %5275 = shalt.err (!%p5272_p2)
}
   0x7   :  { %s5276_s21 = scalar_lea.vmem %s19_s13, 7808  ;;  %p5281_p4 = scmp.lt.s32.totalorder %s19_s13, %s19_s13 }
   0x8   :  { %p5277_p3 = scmp.ne.s32.totalorder %s19_s13, %s5276_s21  ;;  %p5282_p5 = scmp.lt.s32.totalorder %s5276_s21, %s5276_s21 }
   0xa   :  { %p5283_p6 = por %p5282_p5, %p5281_p4 }
   0xc   :  { %p5284_p7 = pnand %p5283_p6, %p5277_p3 }
   0xe   :  { %5287 = shalt.err (!%p5284_p7)
}
   0xf   :  { %s5291_s22 = smov 128   ;;  %s5292_s23 = smov 8  }
  0x10   :  { %24 = dma.hbm_to_vmem [thread:$0]  %s5868_s2, 7808, %s19_s13, [#allocation3], %s5291_s22, %s5291_s22, %s5292_s23  }
  0x11   :  { %5288 = dma.done.wait [#allocation3], 7808  }
  0x12   :  { %5289 = vsyncadd [#allocation3], 4294959488  ;;  %v5293_v0 = vmov 0   ;;  %v31_v1 = vld [vmem:[%s5866_s0] sm:$0xff]  ;;  %v47_v2 = vld [vmem:[#allocation2 + $0x18] sm:$0xff]  ;;  %v5294_v15 = vmov 0.0   ;;  %v33_v16 = vlaneseq }
  0x13   :  { %5170 = vset.pattern.permute.xlu0 %v5293_v0  ;;  %v48_v3 = vld [vmem:[#allocation2 + $0x20] sm:$0xff]  ;;  %v49_v4 = vld [vmem:[#allocation2 + $0x28] sm:$0xff]  ;;  %v50_v5 = vld [vmem:[#allocation2 + $0x30] sm:$0xff]  ;;  %vm57_vm0 = vcmask 523264   ;;  %vm139_vm3 = vcmask 261120   ;;  %s5296_s2 = smov 104  }
  0x14   :  { %36 = vperm.xlu0 %5170, %v31_v1   ;;  %v32_v6 = vld [vmem:[%s5866_s0 + $0x8] sm:$0xff]  ;;  %v5065_v7 = vpack.c.bf16 %v48_v3, %v47_v2  ;;  %v5069_v8 = vpack.c.bf16 %v50_v5, %v49_v4  ;;  %v51_v9 = vld [vmem:[#allocation2 + $0x38] sm:$0xff]  ;;  %v52_v10 = vld [vmem:[#allocation2 + $0x40] sm:$0xff]  ;;  %v34_v17 = vand.u32 127, %v33_v16  ;;  %v5351_v51 = vshrl.u32 %v33_v16, 7  ;;  %s5295_s0 = smov 120  }
  0x15   :  { %v5073_v11 = vpack.c.bf16 %v52_v10, %v51_v9  ;;  %v53_v12 = vld [vmem:[#allocation2 + $0x48] sm:$0xff]  ;;  %v54_v13 = vld [vmem:[#allocation2 + $0x50] sm:$0xff]  ;;  %v55_v22 = vld [vmem:[#allocation2 + $0x58] sm:$0xff]  ;;  %s5297_s30 = smov 112   ;;  %vm5298_vm4 = vmmov 0   ;;  %s5299_s4 = smov 96  }
  0x16   :  { %5066 = vmatprep.subr.bf16.mxu0 %v5065_v7  ;;  %v5077_v14 = vpack.c.bf16 %v54_v13, %v53_v12  ;;  %v56_v24 = vld [vmem:[#allocation2 + $0x60] sm:$0xff]  ;;  %v206_v40 = vld [vmem:[#allocation2 + $0x68] sm:$0xff]  ;;  %v207_v41 = vld [vmem:[#allocation2 + $0x70] sm:$0xff]  ;;  %v5354_v53 = vsub.s32 0, %v5351_v51  ;;  %v5357_v55 = vsub.s32 1, %v5351_v51  ;;  %vm337_vm5 = vcmask 64512  }
  0x17   :  { %5068 = vmatpush3.bf16.msra.mxu0 %v5065_v7  ;;  %v208_v42 = vld [vmem:[#allocation2 + $0x78] sm:$0xff]  ;;  %v5081_v43 = vpack.c.bf16 %v207_v41, %v206_v40  ;;  %v209_v44 = vld [vmem:[#allocation2 + $0x80] sm:$0xff]  ;;  %v30_v54 = vld [vmem:[#allocation2 + $0x10] sm:$0xff]  ;;  %vm4334_vm6 = vcmask 1041409   ;;  %vm4498_vm7 = vcmask 1041408   ;;  %vm4500_vm8 = vcmask 1043456  }
  0x18   :  { %39 = vperm.xlu0 %5170, %v32_v6   ;;  %5070 = vmatprep.subr.bf16.mxu0 %v5069_v8  ;;  %v5085_v45 = vpack.c.bf16 %v209_v44, %v208_v42  ;;  %v170_v56 = vrot.slane %v30_v54, %v5354_v53  ;;  %v176_v59 = vrot.slane %v30_v54, %v5357_v55  ;;  %v5369_v2 = vld [vmem:[#allocation2] sm:$0xff] }
  0x19   :  { %5082 = vmatprep.subr.bf16.mxu1 %v5081_v43  ;;  %v213_v3 = vrot.slane %v5369_v2, %v5354_v53 }
  0x1a   :  { %5084 = vmatpush3.bf16.msra.mxu1 %v5081_v43 }
  0x1b   :  { %5072 = vmatpush3.bf16.msra.mxu0 %v5069_v8  ;;  %5086 = vmatprep.subr.bf16.mxu1 %v5085_v45 }
  0x1c   :  { %5074 = vmatprep.subr.bf16.mxu0 %v5073_v11 }
  0x1e   :  { %5088 = vmatpush3.bf16.msra.mxu1 %v5085_v45 }
  0x1f   :  { %5076 = vmatpush3.bf16.msra.mxu0 %v5073_v11  ;;  %4772 = vmatprep.subr.mxu1 %v5294_v15 }
  0x20   :  { %5078 = vmatprep.subr.bf16.mxu0 %v5077_v14 }
  0x23   :  { %5080 = vmatpush3.bf16.msra.mxu0 %v5077_v14 }
  0x24   :  { %4792 = vmatprep.subr.mxu0 %v5294_v15 }
  0x93   :  { %v37_v18 = vpop.permute.xlu0 %36 }
  0x94   :  { %vm41_vm1 = vcmp.eq.s32.totalorder %v34_v17, %v37_v18 }
  0x95   :  { %v4508_v19 = vsel %vm41_vm1, 1.0, %v5294_v15 }
  0x96   :  { %4758 = vmatprep.mubr.msk.f32.mxu0 %vm57_vm0, %v4508_v19 }
  0x97   :  { %v40_v20 = vpop.permute.xlu0 %39 }
  0x98   :  { %vm42_vm2 = vcmp.eq.s32.totalorder %v34_v17, %v40_v20 }
  0x99   :  { %v4509_v21 = vsel %vm42_vm2, 1.0, %v5294_v15 }
  0x9a   :  { %4759 = vmatmul.mubr.msk.f32.vlgmr.msra.gmra.mrb[0].mxu0 %vm57_vm0, %v4509_v21 }
  0x9b   :  { %4794 = vmatprep.mubr.msk.f32.mxu0 %vm5298_vm4, %v5294_v15 }
 0x16d   :  { %v4760_v23 = vpop.f32.mrb[0].mxu0 }
 0x16e   :  { %v130_v25 = vpop.f32.mrb[1].mxu0  ;;  %v136_v27 = vadd.f32 %v4760_v23, %v56_v24 }
 0x16f   :  { %v131_v26 = vadd.f32 %v130_v25, %v55_v22 }
 0x170   :  { %v143_v29 = vsel %vm139_vm3, %v136_v27, 0.0 }
 0x171   :  { %v140_v28 = vsel %vm139_vm3, %v131_v26, 0.0 }
 0x172   :  { %141 = vadd.xlane.f32.xlu1 %v140_v28 }
 0x176   :  { %144 = vadd.xlane.f32.xlu1 %v143_v29 }
 0x1ff   :  { %v142_v30 = vpop.xlane.xlu1 %141 }
 0x200   :  { %v147_v31 = vmul.f32 0.03125, %v142_v30 }
 0x202   :  { %v149_v32 = vsub.f32 %v131_v26, %v147_v31  ;;  %v179_v31 = vld [vmem:[%s5867_s1] sm:$0x3]  ;;  %s5301_s1 = smov 64  }
 0x203   :  { %v145_v33 = vpop.xlane.xlu1 %144 }
 0x204   :  { %v148_v34 = vmul.f32 0.03125, %v145_v33  ;;  %v151_v35 = vmul.f32 %v149_v32, %v149_v32  ;;  %v5300_v33 = vmov 1966171168  }
 0x206   :  { %v150_v36 = vsub.f32 %v136_v27, %v148_v34  ;;  %v153_v37 = vsel %vm139_vm3, %v151_v35, 0.0  ;;  %v185_v34 = vunpack.c.l.s4 %v5300_v33 }
 0x207   :  { %154 = vadd.xlane.f32.xlu0 %v153_v37 }
 0x208   :  { %v152_v38 = vmul.f32 %v150_v36, %v150_v36 }
 0x20a   :  { %v156_v39 = vsel %vm139_vm3, %v152_v38, 0.0 }
 0x20b   :  { %157 = vadd.xlane.f32.xlu1 %v156_v39 }
 0x294   :  { %v155_v46 = vpop.xlane.xlu0 %154 }
 0x295   :  { %v159_v47 = vmul.f32 0.03125, %v155_v46 }
 0x297   :  { %v161_v48 = vadd.f32 1e-12, %v159_v47 }
 0x298   :  { %v158_v49 = vpop.xlane.xlu1 %157 }
 0x299   :  { %5171 = vrsqrt.f32 %v161_v48  ;;  %v160_v50 = vmul.f32 0.03125, %v158_v49 }
 0x29b   :  { %v162_v52 = vadd.f32 1e-12, %v160_v50 }
 0x29d   :  { %5173 = vrsqrt.f32 %v162_v52 }
 0x2a3   :  { %v5172_v57 = vpop.eup %5171 }
 0x2a4   :  { %v165_v58 = vmul.f32 %v5172_v57, %v149_v32  ;;  %v180_v32 = vcvt.s32.f32 %v179_v31 }
 0x2a6   :  { %v171_v60 = vmul.f32 %v170_v56, %v165_v58  ;;  %v181_v35 = vsub.f32 1.0, %v180_v32 }
 0x2a7   :  { %v5174_v61 = vpop.eup %5173 }
 0x2a8   :  { %v166_v62 = vmul.f32 %v5174_v61, %v150_v36  ;;  %v5361_v63 = vadd.f32 %v176_v59, %v171_v60  ;;  %v186_v36 = vunpack.c.0.s8 %v185_v34  ;;  %v182_v37 = vmul.f32 -1e+09, %v181_v35 }
 0x2aa   :  { %v172_v0 = vmul.f32 %v170_v56, %v166_v62  ;;  %4769 = vmatprep.mubr.msk.f32.mxu1 %vm139_vm3, %v5361_v63  ;;  %v189_v38 = vsub.s32 %v186_v36, %v5351_v51 }
 0x2ac   :  { %v5365_v1 = vadd.f32 %v176_v59, %v172_v0  ;;  %v190_v39 = vrot.slane %v182_v37, %v189_v38 }
 0x2ae   :  { %4770 = vmatmul.mubr.msk.f32.vlgmr.msra.gmra.mrb[0].mxu1 %vm139_vm3, %v5365_v1  ;;  %v191_v40 = vcombine.high %v190_v39, %v190_v39  ;;  %v198_v41 = vrot.slane %v190_v39, %v189_v38 }
 0x2af   :  { %4774 = vmatprep.mubr.msk.f32.mxu1 %vm5298_vm4, %v5294_v15 }
 0x2b0   :  { %v205_v42 = vrot.slane %v191_v40, %v189_v38  ;;  %v5474_v43 = vrot.slane %v198_v41, %v5354_v53 }
 0x2b2   :  { %v5477_v45 = vrot.slane %v205_v42, %v5354_v53 }
 0x381   :  { %v4771_v4 = vpop.f32.mrb[0].mxu1 }
 0x382   :  { %v5373_v5 = vadd.f32 %v4771_v4, %v213_v3  ;;  %v286_v6 = vpop.f32.mrb[1].mxu1 }
 0x383   :  { %v5375_v7 = vadd.f32 %v286_v6, %v213_v3 }
 0x384   :  { %315 = vrot.lane.b32.xlu1 %v5373_v5, %s5295_s0  ;;  %v296_v8 = vmul.f32 0.35355338, %v5373_v5 }
 0x385   :  { %321 = vrot.lane.b32.xlu0 %v5375_v7, %s5296_s2  ;;  %v295_v9 = vmul.f32 0.35355338, %v5375_v7 }
 0x388   :  { %313 = vrot.lane.b32.xlu1 %v5375_v7, %s5295_s0 }
 0x38c   :  { %317 = vrot.lane.b32.xlu1 %v5375_v7, %s5297_s30 }
 0x390   :  { %319 = vrot.lane.b32.xlu1 %v5373_v5, %s5297_s30 }
 0x394   :  { %323 = vrot.lane.b32.xlu1 %v5373_v5, %s5296_s2 }
 0x398   :  { %412 = vrot.lane.b32.xlu1 %v5373_v5, %s5299_s4 }
 0x39c   :  { %335 = vrot.lane.b32.xlu1 %v5375_v7, %s5299_s4 }
 0x3a0   :  { %301 = vrot.lane.b32.xlu1 %v296_v8, %s5295_s0 }
 0x3a4   :  { %299 = vrot.lane.b32.xlu1 %v295_v9, %s5295_s0 }
 0x3f6   :  { %v5401_v10 = vpop.permute.xlu1 %315 }
 0x3f7   :  { %564 = vrot.lane.b32.xlu0 %v5401_v10, %s5299_s4  ;;  %v5414_v13 = vpop.permute.xlu0 %321 }
 0x3fa   :  { %v5405_v11 = vpop.permute.xlu1 %313 }
 0x3fb   :  { %303 = vrot.lane.b32.xlu0 %v295_v9, %s5297_s30  ;;  %488 = vrot.lane.b32.xlu1 %v5405_v11, %s5299_s4 }
 0x3fe   :  { %v5410_v12 = vpop.permute.xlu1 %317 }
 0x3ff   :  { %640 = vrot.lane.b32.xlu0 %v5410_v12, %s5299_s4 }
 0x402   :  { %v5416_v14 = vpop.permute.xlu1 %319 }
 0x403   :  { %792 = vrot.lane.b32.xlu0 %v5414_v13, %s5299_s4  ;;  %716 = vrot.lane.b32.xlu1 %v5416_v14, %s5299_s4 }
 0x406   :  { %v5422_v16 = vpop.permute.xlu1 %323 }
 0x407   :  { %307 = vrot.lane.b32.xlu0 %v295_v9, %s5296_s2  ;;  %305 = vrot.lane.b32.xlu1 %v296_v8, %s5297_s30 }
 0x40a   :  { %v413_v17 = vpop.permute.xlu1 %412 }
 0x40b   :  { %868 = vrot.lane.b32.xlu1 %v5422_v16, %s5299_s4 }
 0x40e   :  { %v336_v18 = vpop.permute.xlu1 %335 }
 0x40f   :  { %4773 = vmatpush3.xpose.msk.msra.mxu1 %vm337_vm5, %v336_v18  ;;  %309 = vrot.lane.b32.xlu1 %v296_v8, %s5296_s2 }
 0x410   :  { %4777 = vmatprep.subr.mxu1 %v5294_v15 }
 0x412   :  { %4775 = vmatmul.mubr.msk.f32.vlgmr.msra.gmra.mrb[2].mxu1 %vm337_vm5, %v295_v9  ;;  %v302_v19 = vpop.permute.xlu1 %301 }
 0x413   :  { %4778 = vmatpush3.xpose.msk.msra.mxu1 %vm337_vm5, %v413_v17  ;;  %4779 = vmatprep.mubr.msk.f32.mxu1 %vm5298_vm4, %v5294_v15 }
 0x414   :  { %4782 = vmatprep.subr.mxu1 %v5294_v15 }
 0x416   :  { %4780 = vmatmul.mubr.msk.f32.vlgmr.msra.gmra.mrb[4].mxu1 %vm337_vm5, %v296_v8  ;;  %v300_v20 = vpop.permute.xlu1 %299 }
 0x417   :  { %4784 = vmatprep.mubr.msk.f32.mxu1 %vm5298_vm4, %v5294_v15 }
 0x469   :  { %v565_v21 = vpop.permute.xlu0 %564 }
 0x46d   :  { %v304_v22 = vpop.permute.xlu0 %303  ;;  %v489_v23 = vpop.permute.xlu1 %488 }
 0x46e   :  { %4783 = vmatpush3.xpose.msk.msra.mxu1 %vm337_vm5, %v489_v23 }
 0x46f   :  { %4787 = vmatprep.subr.mxu1 %v5294_v15 }
 0x471   :  { %v641_v24 = vpop.permute.xlu0 %640  ;;  %4785 = vmatmul.mubr.msk.f32.vlgmr.msra.gmra.mrb[6].mxu1 %vm337_vm5, %v300_v20 }
 0x472   :  { %4788 = vmatpush3.xpose.msk.msra.mxu1 %vm337_vm5, %v565_v21  ;;  %4793 = vmatpush3.xpose.msk.msra.mxu0 %vm337_vm5, %v641_v24 }
 0x473   :  { %4789 = vmatprep.mubr.msk.f32.mxu1 %vm5298_vm4, %v5294_v15  ;;  %4802 = vmatprep.subr.mxu0 %v5294_v15 }
 0x474   :  { %4797 = vmatprep.subr.mxu1 %v5294_v15 }
 0x475   :  { %4795 = vmatmul.mubr.msk.f32.vlgmr.msra.gmra.mrb[2].mxu0 %vm337_vm5, %v304_v22  ;;  %v793_v25 = vpop.permute.xlu0 %792  ;;  %v717_v26 = vpop.permute.xlu1 %716  ;;  %4790 = vmatmul.mubr.msk.f32.vlgmr.msra.gmra.mrb[8].mxu1 %vm337_vm5, %v302_v19 }
 0x476   :  { %4798 = vmatpush3.xpose.msk.msra.mxu1 %vm337_vm5, %v717_v26  ;;  %4803 = vmatpush3.xpose.msk.msra.mxu0 %vm337_vm5, %v793_v25 }
 0x477   :  { %4804 = vmatprep.mubr.msk.f32.mxu0 %vm5298_vm4, %v5294_v15  ;;  %4799 = vmatprep.mubr.msk.f32.mxu1 %vm5298_vm4, %v5294_v15 }
 0x478   :  { %4807 = vmatprep.subr.mxu1 %v5294_v15  ;;  %4812 = vmatprep.subr.mxu0 %v5294_v15 }
 0x479   :  { %v308_v27 = vpop.permute.xlu0 %307  ;;  %v306_v28 = vpop.permute.xlu1 %305 }
 0x47a   :  { %4800 = vmatmul.mubr.msk.f32.vlgmr.msra.gmra.mrb[10].mxu1 %vm337_vm5, %v306_v28  ;;  %4805 = vmatmul.mubr.msk.f32.vlgmr.msra.gmra.mrb[4].mxu0 %vm337_vm5, %v308_v27 }
 0x47b   :  { %4809 = vmatprep.mubr.msk.f32.mxu1 %vm5298_vm4, %v5294_v15  ;;  %4814 = vmatprep.mubr.msk.f32.mxu0 %vm5298_vm4, %v5294_v15 }
 0x47d   :  { %v869_v29 = vpop.permute.xlu1 %868 }
 0x47e   :  { %4808 = vmatpush3.xpose.msk.msra.mxu1 %vm337_vm5, %v869_v29 }
 0x47f   :  { %4817 = vmatprep.subr.mxu1 %v5294_v15 }
 0x481   :  { %v310_v30 = vpop.permute.xlu1 %309 }
 0x482   :  { %4810 = vmatmul.mubr.msk.f32.vlgmr.msra.gmra.mrb[12].mxu1 %vm337_vm5, %v310_v30 }
 0x483   :  { %4819 = vmatprep.mubr.msk.f32.mxu1 %vm5298_vm4, %v5294_v15 }
 0x4e5   :  { %v408_v44 = vpop.f32.mrb[2].mxu1 }
 0x4e6   :  { %v409_v46 = vadd.f32 %v408_v44, %v5474_v43  ;;  %v4776_v47 = vpop.f32.mrb[3].mxu1 }
 0x4e8   :  { %v944_v48 = vsel %vm337_vm5, %v409_v46, -inf }
 0x4e9   :  { %945 = vmax.xlane.f32.xlu0 %v944_v48  ;;  %v484_v49 = vpop.f32.mrb[4].mxu1 }
 0x4ea   :  { %v485_v50 = vadd.f32 %v484_v49, %v5477_v45  ;;  %v4781_v52 = vpop.f32.mrb[5].mxu1 }
 0x4ec   :  { %v947_v54 = vsel %vm337_vm5, %v485_v50, -inf }
 0x4ed   :  { %948 = vmax.xlane.f32.xlu1 %v947_v54 }
 0x544   :  { %v560_v56 = vpop.f32.mrb[6].mxu1 }
 0x545   :  { %v561_v57 = vadd.f32 %v560_v56, %v5474_v43  ;;  %v4786_v58 = vpop.f32.mrb[7].mxu1 }
 0x547   :  { %v950_v59 = vsel %vm337_vm5, %v561_v57, -inf }
 0x548   :  { %v712_v60 = vpop.f32.mrb[2].mxu0  ;;  %951 = vmax.xlane.f32.xlu0 %v950_v59  ;;  %v636_v61 = vpop.f32.mrb[8].mxu1 }
 0x549   :  { %v713_v62 = vadd.f32 %v712_v60, %v5474_v43  ;;  %v637_v0 = vadd.f32 %v636_v61, %v5477_v45  ;;  %v4791_v3 = vpop.f32.mrb[9].mxu1  ;;  %v4796_v4 = vpop.f32.mrb[3].mxu0 }
 0x54b   :  { %v956_v6 = vsel %vm337_vm5, %v713_v62, -inf  ;;  %v953_v8 = vsel %vm337_vm5, %v637_v0, -inf }
 0x54c   :  { %957 = vmax.xlane.f32.xlu1 %v956_v6  ;;  %954 = vmax.xlane.f32.xlu0 %v953_v8 }
 0x54d   :  { %v788_v9 = vpop.f32.mrb[10].mxu1  ;;  %v864_v17 = vpop.f32.mrb[4].mxu0 }
 0x54e   :  { %v789_v18 = vadd.f32 %v788_v9, %v5477_v45  ;;  %v865_v19 = vadd.f32 %v864_v17, %v5474_v43  ;;  %v4801_v20 = vpop.f32.mrb[11].mxu1  ;;  %v4806_v21 = vpop.f32.mrb[5].mxu0 }
 0x550   :  { %v962_v22 = vsel %vm337_vm5, %v865_v19, -inf  ;;  %v959_v23 = vsel %vm337_vm5, %v789_v18, -inf }
 0x551   :  { %963 = vmax.xlane.f32.xlu1 %v962_v22  ;;  %960 = vmax.xlane.f32.xlu0 %v959_v23 }
 0x555   :  { %v940_v24 = vpop.f32.mrb[12].mxu1 }
 0x556   :  { %v941_v25 = vadd.f32 %v940_v24, %v5477_v45  ;;  %v4811_v26 = vpop.f32.mrb[13].mxu1 }
 0x558   :  { %v965_v27 = vsel %vm337_vm5, %v941_v25, -inf }
 0x559   :  { %966 = vmax.xlane.f32.xlu0 %v965_v27 }
 0x562   :  { %1032 = vrot.lane.b32.xlu1 %v5375_v7, %s5301_s1 }
 0x566   :  { %1184 = vrot.lane.b32.xlu1 %v5405_v11, %s5301_s1 }
 0x56a   :  { %1260 = vrot.lane.b32.xlu1 %v5401_v10, %s5301_s1 }
 0x56e   :  { %1412 = vrot.lane.b32.xlu1 %v5416_v14, %s5301_s1 }
 0x56f   :  { %1108 = vrot.lane.b32.xlu0 %v5373_v5, %s5301_s1 }
 0x573   :  { %1336 = vrot.lane.b32.xlu0 %v5410_v12, %s5301_s1 }
 0x576   :  { %v946_v28 = vpop.xlane.xlu0 %945 }
 0x577   :  { %v968_v30 = vsub.f32 %v409_v46, %v946_v28 }
 0x579   :  { %v976_v7 = vmul.f32 1.442695, %v968_v30 }
 0x57a   :  { %v949_v29 = vpop.xlane.xlu1 %948 }
 0x57b   :  { %v969_v31 = vsub.f32 %v485_v50, %v949_v29  ;;  %5175 = vpow2.f32 %v976_v7 }
 0x57d   :  { %v978_v32 = vmul.f32 1.442695, %v969_v31 }
 0x57f   :  { %5177 = vpow2.f32 %v978_v32 }
 0x585   :  { %v5507_v11 = vpop.eup %5175 }
 0x586   :  { %v992_v14 = vsel %vm337_vm5, %v5507_v11, 0.0 }
 0x589   :  { %v5509_v10 = vpop.eup %5177 }
 0x58a   :  { %v995_v5 = vsel %vm337_vm5, %v5509_v10, 0.0 }
 0x592   :  { %993 = vadd.xlane.f32.xlu1 %v992_v14  ;;  %996 = vadd.xlane.f32.xlu0 %v995_v5 }
 0x5d5   :  { %v952_v12 = vpop.xlane.xlu0 %951 }
 0x5d6   :  { %v970_v33 = vsub.f32 %v561_v57, %v952_v12  ;;  %v1640_v12 = vld [vmem:[#allocation2 + $0x88] sm:$0xff] }
 0x5d8   :  { %v980_v34 = vmul.f32 1.442695, %v970_v33 }
 0x5d9   :  { %v958_v35 = vpop.xlane.xlu1 %957  ;;  %v955_v36 = vpop.xlane.xlu0 %954 }
 0x5da   :  { %5179 = vpow2.f32 %v980_v34  ;;  %v972_v37 = vsub.f32 %v713_v62, %v958_v35  ;;  %v971_v38 = vsub.f32 %v637_v0, %v955_v36 }
 0x5dc   :  { %v984_v39 = vmul.f32 1.442695, %v972_v37  ;;  %v982_v40 = vmul.f32 1.442695, %v971_v38 }
 0x5de   :  { %5181 = vpow2.f32 %v984_v39  ;;  %v964_v41 = vpop.xlane.xlu1 %963  ;;  %v961_v42 = vpop.xlane.xlu0 %960 }
 0x5df   :  { %5183 = vpow2.f32 %v982_v40  ;;  %v974_v44 = vsub.f32 %v865_v19, %v964_v41  ;;  %v973_v46 = vsub.f32 %v789_v18, %v961_v42  ;;  %v1641_v40 = vld [vmem:[#allocation2 + $0x90] sm:$0xff]  ;;  %v1642_v41 = vld [vmem:[#allocation2 + $0x98] sm:$0xff]  ;;  %v1643_v42 = vld [vmem:[#allocation2 + $0xa0] sm:$0xff] }
 0x5e1   :  { %v988_v47 = vmul.f32 1.442695, %v974_v44  ;;  %v986_v48 = vmul.f32 1.442695, %v973_v46 }
 0x5e2   :  { %v1033_v49 = vpop.permute.xlu1 %1032 }
 0x5e3   :  { %5185 = vpow2.f32 %v988_v47  ;;  %4813 = vmatpush3.msra.mxu0 %v1033_v49 }
 0x5e4   :  { %v5180_v50 = vpop.eup %5179  ;;  %5187 = vpow2.f32 %v986_v48  ;;  %4822 = vmatprep.subr.mxu0 %v5294_v15 }
 0x5e5   :  { %v998_v52 = vsel %vm337_vm5, %v5180_v50, 0.0 }
 0x5e6   :  { %999 = vadd.xlane.f32.xlu1 %v998_v52  ;;  %v967_v54 = vpop.xlane.xlu0 %966  ;;  %v1185_v17 = vpop.permute.xlu1 %1184 }
 0x5e7   :  { %v975_v56 = vsub.f32 %v941_v25, %v967_v54 }
 0x5e8   :  { %v5182_v57 = vpop.eup %5181 }
 0x5e9   :  { %v5184_v58 = vpop.eup %5183  ;;  %v990_v59 = vmul.f32 1.442695, %v975_v56  ;;  %v1004_v60 = vsel %vm337_vm5, %v5182_v57, 0.0 }
 0x5ea   :  { %1005 = vadd.xlane.f32.xlu1 %v1004_v60  ;;  %v1001_v61 = vsel %vm337_vm5, %v5184_v58, 0.0  ;;  %v1109_v62 = vpop.permute.xlu0 %1108  ;;  %v1261_v18 = vpop.permute.xlu1 %1260 }
 0x5eb   :  { %5189 = vpow2.f32 %v990_v59  ;;  %1002 = vadd.xlane.f32.xlu0 %v1001_v61  ;;  %4818 = vmatpush3.msra.mxu1 %v1109_v62 }
 0x5ec   :  { %4827 = vmatprep.subr.mxu1 %v5294_v15 }
 0x5ed   :  { %v5186_v0 = vpop.eup %5185 }
 0x5ee   :  { %v5520_v3 = vpop.eup %5187  ;;  %v1010_v4 = vsel %vm337_vm5, %v5186_v0, 0.0  ;;  %v1413_v19 = vpop.permute.xlu1 %1412 }
 0x5ef   :  { %1011 = vadd.xlane.f32.xlu1 %v1010_v4  ;;  %v1007_v6 = vsel %vm337_vm5, %v5520_v3, 0.0  ;;  %v1337_v20 = vpop.permute.xlu0 %1336 }
 0x5f0   :  { %1008 = vadd.xlane.f32.xlu0 %v1007_v6 }
 0x5f5   :  { %v5525_v8 = vpop.eup %5189 }
 0x5f6   :  { %v1013_v9 = vsel %vm337_vm5, %v5525_v8, 0.0 }
 0x5f7   :  { %1014 = vadd.xlane.f32.xlu0 %v1013_v9 }
 0x600   :  { %1564 = vrot.lane.b32.xlu1 %v5422_v16, %s5301_s1 }
 0x60d   :  { %1488 = vrot.lane.b32.xlu0 %v5414_v13, %s5301_s1 }
 0x61f   :  { %v994_v21 = vpop.xlane.xlu1 %993  ;;  %v997_v22 = vpop.xlane.xlu0 %996 }
 0x620   :  { %5191 = vrcp.f32 %v994_v21 }
 0x621   :  { %5193 = vrcp.f32 %v997_v22 }
 0x62a   :  { %v5192_v23 = vpop.eup %5191 }
 0x62b   :  { %v5194_v24 = vpop.eup %5193  ;;  %v1024_v25 = vmul.f32 %v5192_v23, %v5507_v11 }
 0x62c   :  { %v1025_v26 = vmul.f32 %v5194_v24, %v5509_v10 }
 0x62d   :  { %4815 = vmatmul.mubr.msk.f32.vlgmr.msra.gmra.mrb[6].mxu0 %vm337_vm5, %v1024_v25 }
 0x62e   :  { %4820 = vmatmul.mubr.msk.f32.vlgmr.msra.gmra.mrb[14].mxu1 %vm337_vm5, %v1025_v26  ;;  %4823 = vmatpush3.msra.mxu0 %v1185_v17 }
 0x62f   :  { %4828 = vmatpush3.msra.mxu1 %v1261_v18  ;;  %4824 = vmatprep.mubr.msk.f32.mxu0 %vm5298_vm4, %v5294_v15 }
 0x630   :  { %4832 = vmatprep.subr.mxu0 %v5294_v15  ;;  %4829 = vmatprep.mubr.msk.f32.mxu1 %vm5298_vm4, %v5294_v15 }
 0x631   :  { %4837 = vmatprep.subr.mxu1 %v5294_v15 }
 0x673   :  { %v1000_v13 = vpop.xlane.xlu1 %999 }
 0x674   :  { %5195 = vrcp.f32 %v1000_v13 }
 0x677   :  { %v1006_v16 = vpop.xlane.xlu1 %1005 }
 0x678   :  { %5197 = vrcp.f32 %v1006_v16  ;;  %v1003_v27 = vpop.xlane.xlu0 %1002 }
 0x679   :  { %5199 = vrcp.f32 %v1003_v27  ;;  %v1985_v27 = vrot.slane %v5369_v2, %v5357_v55 }
 0x67c   :  { %v1012_v28 = vpop.xlane.xlu1 %1011 }
 0x67d   :  { %5201 = vrcp.f32 %v1012_v28  ;;  %v1009_v29 = vpop.xlane.xlu0 %1008 }
 0x67e   :  { %v5196_v30 = vpop.eup %5195  ;;  %5203 = vrcp.f32 %v1009_v29 }
 0x67f   :  { %v1026_v31 = vmul.f32 %v5196_v30, %v5180_v50 }
 0x680   :  { %v1565_v37 = vpop.permute.xlu1 %1564 }
 0x681   :  { %4825 = vmatmul.mubr.msk.f32.vlgmr.msra.gmra.mrb[8].mxu0 %vm337_vm5, %v1026_v31 }
 0x682   :  { %v5198_v7 = vpop.eup %5197  ;;  %4833 = vmatpush3.msra.mxu0 %v1337_v20  ;;  %4834 = vmatprep.mubr.msk.f32.mxu0 %vm5298_vm4, %v5294_v15 }
 0x683   :  { %v5200_v32 = vpop.eup %5199  ;;  %v1028_v11 = vmul.f32 %v5198_v7, %v5182_v57  ;;  %4842 = vmatprep.subr.mxu0 %v5294_v15 }
 0x684   :  { %v1027_v10 = vmul.f32 %v5200_v32, %v5184_v58  ;;  %v1015_v14 = vpop.xlane.xlu0 %1014 }
 0x685   :  { %5205 = vrcp.f32 %v1015_v14  ;;  %4835 = vmatmul.mubr.msk.f32.vlgmr.msra.gmra.mrb[10].mxu0 %vm337_vm5, %v1028_v11 }
 0x686   :  { %4830 = vmatmul.mubr.msk.f32.vlgmr.msra.gmra.mrb[16].mxu1 %vm337_vm5, %v1027_v10  ;;  %4844 = vmatprep.mubr.msk.f32.mxu0 %vm5298_vm4, %v5294_v15 }
 0x687   :  { %v5202_v5 = vpop.eup %5201  ;;  %4838 = vmatpush3.msra.mxu1 %v1413_v19  ;;  %4839 = vmatprep.mubr.msk.f32.mxu1 %vm5298_vm4, %v5294_v15 }
 0x688   :  { %v5204_v33 = vpop.eup %5203  ;;  %v1030_v34 = vmul.f32 %v5202_v5, %v5186_v0  ;;  %v1489_v35 = vpop.permute.xlu0 %1488  ;;  %4847 = vmatprep.subr.mxu1 %v5294_v15 }
 0x689   :  { %v1029_v36 = vmul.f32 %v5204_v33, %v5520_v3  ;;  %4843 = vmatpush3.msra.mxu0 %v1489_v35 }
 0x68a   :  { %4845 = vmatmul.mubr.msk.f32.vlgmr.msra.gmra.mrb[12].mxu0 %vm337_vm5, %v1030_v34  ;;  %4852 = vmatprep.subr.mxu0 %v1640_v12 }
 0x68b   :  { %4840 = vmatmul.mubr.msk.f32.vlgmr.msra.gmra.mrb[18].mxu1 %vm337_vm5, %v1029_v36  ;;  %4853 = vmatpush3.msra.mxu0 %v1640_v12 }
 0x68c   :  { %4848 = vmatpush3.msra.mxu1 %v1565_v37  ;;  %4849 = vmatprep.mubr.msk.f32.mxu1 %vm5298_vm4, %v5294_v15 }
 0x68d   :  { %4857 = vmatprep.subr.mxu1 %v1641_v40  ;;  %4862 = vmatprep.subr.mxu0 %v1642_v41 }
 0x68f   :  { %v5206_v38 = vpop.eup %5205 }
 0x690   :  { %v1031_v39 = vmul.f32 %v5206_v38, %v5525_v8 }
 0x692   :  { %4850 = vmatmul.mubr.msk.f32.vlgmr.msra.gmra.mrb[20].mxu1 %vm337_vm5, %v1031_v39 }
 0x693   :  { %4858 = vmatpush3.msra.mxu1 %v1641_v40 }
 0x694   :  { %4867 = vmatprep.subr.mxu1 %v1643_v42 }
 0x700   :  { %v1104_v44 = vpop.f32.mrb[6].mxu0 }
 0x701   :  { %v1180_v46 = vpop.f32.mrb[14].mxu1  ;;  %v4816_v47 = vpop.f32.mrb[7].mxu0  ;;  %4854 = vmatprep.mubr.msk.f32.mxu0 %vm337_vm5, %v1104_v44 }
 0x702   :  { %v4821_v48 = vpop.f32.mrb[15].mxu1  ;;  %4855 = vmatmul.mubr.msk.f32.vlgmr.msra.gmra.mrb[14].mxu0 %vm337_vm5, %v1180_v46  ;;  %v2030_v46 = vld [vmem:[#allocation2 + $0xb8] sm:$0xff]  ;;  %v2031_v47 = vld [vmem:[#allocation2 + $0xc0] sm:$0xff] }
 0x703   :  { %4863 = vmatpush3.msra.mxu0 %v1642_v41  ;;  %v5093_v48 = vpack.c.bf16 %v2031_v47, %v2030_v46  ;;  %v2145_v46 = vsub.s32 5, %v5351_v51 }
 0x705   :  { %v2146_v47 = vrot.slane %v5369_v2, %v2145_v46 }
 0x754   :  { %v1256_v49 = vpop.f32.mrb[8].mxu0 }
 0x755   :  { %v4826_v50 = vpop.f32.mrb[9].mxu0  ;;  %4859 = vmatprep.mubr.msk.f32.mxu1 %vm337_vm5, %v1256_v49 }
 0x758   :  { %v1408_v52 = vpop.f32.mrb[10].mxu0 }
 0x759   :  { %v1332_v54 = vpop.f32.mrb[16].mxu1  ;;  %v4836_v56 = vpop.f32.mrb[11].mxu0  ;;  %4864 = vmatprep.mubr.msk.f32.mxu0 %vm337_vm5, %v1408_v52 }
 0x75a   :  { %v4831_v57 = vpop.f32.mrb[17].mxu1  ;;  %4860 = vmatmul.mubr.msk.f32.vlgmr.msra.gmra.mrb[22].mxu1 %vm337_vm5, %v1332_v54 }
 0x75b   :  { %4868 = vmatpush3.msra.mxu1 %v1643_v42  ;;  %v2029_v42 = vld [vmem:[#allocation2 + $0xb0] sm:$0xff] }
 0x75d   :  { %v1560_v58 = vpop.f32.mrb[12].mxu0 }
 0x75e   :  { %v1484_v59 = vpop.f32.mrb[18].mxu1  ;;  %v4846_v60 = vpop.f32.mrb[13].mxu0  ;;  %4869 = vmatprep.mubr.msk.f32.mxu1 %vm337_vm5, %v1560_v58  ;;  %v5586_v58 = vsub.s32 2, %v5351_v51 }
 0x75f   :  { %v4841_v61 = vpop.f32.mrb[19].mxu1  ;;  %4865 = vmatmul.mubr.msk.f32.vlgmr.msra.gmra.mrb[16].mxu0 %vm337_vm5, %v1484_v59  ;;  %v5589_v59 = vsub.s32 3, %v5351_v51 }
 0x760   :  { %v2019_v60 = vrot.slane %v5369_v2, %v5586_v58 }
 0x765   :  { %v1636_v62 = vpop.f32.mrb[20].mxu1 }
 0x766   :  { %v4851_v0 = vpop.f32.mrb[21].mxu1  ;;  %4870 = vmatmul.mubr.msk.f32.vlgmr.msra.gmra.mrb[24].mxu1 %vm337_vm5, %v1636_v62 }
 0x767   :  { %v2025_v0 = vrot.slane %v5369_v2, %v5589_v59 }
 0x7d5   :  { %v4856_v3 = vpop.f32.mrb[14].mxu0 }
 0x7d6   :  { %v1716_v4 = vpop.f32.mrb[15].mxu0  ;;  %v1975_v8 = vsel %vm139_vm3, %v4856_v3, 0.0 }
 0x7d7   :  { %v1968_v18 = vsel %vm139_vm3, %v1716_v4, 0.0 }
 0x82d   :  { %v4861_v6 = vpop.f32.mrb[22].mxu1 }
 0x82e   :  { %v1976_v9 = vsel %vm139_vm3, %v4861_v6, 0.0  ;;  %v1797_v17 = vpop.f32.mrb[23].mxu1 }
 0x82f   :  { %v1977_v19 = vadd.f32 %v1976_v9, %v1975_v8  ;;  %v1969_v20 = vsel %vm139_vm3, %v1797_v17, 0.0 }
 0x830   :  { %v1970_v21 = vadd.f32 %v1969_v20, %v1968_v18  ;;  %v2135_v18 = vld [vmem:[#allocation2 + $0xc8] sm:$0xff]  ;;  %v2137_v20 = vld [vmem:[#allocation2 + $0xd8] sm:$0xff] }
 0x832   :  { %v4866_v22 = vpop.f32.mrb[16].mxu0 }
 0x833   :  { %v1978_v23 = vsel %vm139_vm3, %v4866_v22, 0.0  ;;  %v1878_v24 = vpop.f32.mrb[17].mxu0  ;;  %v2138_v22 = vld [vmem:[#allocation2 + $0xe0] sm:$0xff] }
 0x834   :  { %v1979_v25 = vadd.f32 %v1978_v23, %v1977_v19  ;;  %v1971_v26 = vsel %vm139_vm3, %v1878_v24, 0.0  ;;  %v2136_v19 = vld [vmem:[#allocation2 + $0xd0] sm:$0xff]  ;;  %v5101_v23 = vpack.c.bf16 %v2138_v22, %v2137_v20  ;;  %v2139_v24 = vld [vmem:[#allocation2 + $0xe8] sm:$0xff]  ;;  %v2270_v22 = vld [vmem:[#allocation2 + $0x118] sm:$0xff] }
 0x835   :  { %v1972_v13 = vadd.f32 %v1971_v26, %v1970_v21  ;;  %v5097_v21 = vpack.c.bf16 %v2136_v19, %v2135_v18  ;;  %v2269_v20 = vld [vmem:[#allocation2 + $0x110] sm:$0xff] }
 0x837   :  { %5098 = vmatprep.subr.bf16.mxu1 %v5097_v21 }
 0x838   :  { %5100 = vmatpush3.bf16.msra.mxu1 %v5097_v21 }
 0x839   :  { %v4871_v16 = vpop.f32.mrb[24].mxu1  ;;  %5102 = vmatprep.subr.bf16.mxu1 %v5101_v23 }
 0x83a   :  { %v1980_v28 = vsel %vm139_vm3, %v4871_v16, 0.0  ;;  %v1959_v29 = vpop.f32.mrb[25].mxu1  ;;  %v2142_v16 = vld [vmem:[#allocation2 + $0x100] sm:$0xff] }
 0x83b   :  { %v1981_v30 = vadd.f32 %v1980_v28, %v1979_v25  ;;  %v1973_v31 = vsel %vm139_vm3, %v1959_v29, 0.0  ;;  %v2140_v25 = vld [vmem:[#allocation2 + $0xf0] sm:$0xff]  ;;  %v2034_v28 = vsub.s32 4, %v5351_v51 }
 0x83c   :  { %v1974_v7 = vadd.f32 %v1973_v31, %v1972_v13  ;;  %v5105_v26 = vpack.c.bf16 %v2140_v25, %v2139_v24  ;;  %v2141_v13 = vld [vmem:[#allocation2 + $0xf8] sm:$0xff]  ;;  %5104 = vmatpush3.bf16.msra.mxu1 %v5101_v23  ;;  %v2271_v23 = vld [vmem:[#allocation2 + $0x120] sm:$0xff] }
 0x83d   :  { %v1987_v32 = vadd.f32 %v1985_v27, %v1981_v30  ;;  %v2035_v29 = vrot.slane %v5369_v2, %v2034_v28  ;;  %v5117_v24 = vpack.c.bf16 %v2271_v23, %v2270_v22 }
 0x83e   :  { %v1986_v11 = vadd.f32 %v1985_v27, %v1974_v7  ;;  %5106 = vmatprep.subr.bf16.mxu1 %v5105_v26  ;;  %v5109_v27 = vpack.c.bf16 %v2142_v16, %v2141_v13 }
 0x83f   :  { %v1989_v10 = vadd.f32 %v1987_v32, %v5365_v1 }
 0x840   :  { %v1988_v14 = vadd.f32 %v1986_v11, %v5361_v63  ;;  %v2028_v63 = vld [vmem:[#allocation2 + $0xa8] sm:$0xff]  ;;  %5108 = vmatpush3.bf16.msra.mxu1 %v5105_v26 }
 0x841   :  { %v1993_v5 = vsel %vm139_vm3, %v1989_v10, 0.0  ;;  %v5089_v44 = vpack.c.bf16 %v2029_v42, %v2028_v63  ;;  %5110 = vmatprep.subr.bf16.mxu1 %v5109_v27 }
 0x842   :  { %1994 = vadd.xlane.f32.xlu1 %v1993_v5  ;;  %v1990_v12 = vsel %vm139_vm3, %v1988_v14, 0.0 }
 0x843   :  { %1991 = vadd.xlane.f32.xlu0 %v1990_v12  ;;  %5090 = vmatprep.subr.bf16.mxu0 %v5089_v44 }
 0x844   :  { %5092 = vmatpush3.bf16.msra.mxu0 %v5089_v44  ;;  %5112 = vmatpush3.bf16.msra.mxu1 %v5109_v27 }
 0x845   :  { %5094 = vmatprep.subr.bf16.mxu0 %v5093_v48  ;;  %4918 = vmatprep.subr.mxu1 %v5294_v15 }
 0x848   :  { %5096 = vmatpush3.bf16.msra.mxu0 %v5093_v48 }
 0x8cf   :  { %v1995_v33 = vpop.xlane.xlu1 %1994 }
 0x8d0   :  { %v1997_v34 = vmul.f32 0.03125, %v1995_v33  ;;  %v1992_v35 = vpop.xlane.xlu0 %1991 }
 0x8d1   :  { %v1996_v36 = vmul.f32 0.03125, %v1992_v35 }
 0x8d2   :  { %v1999_v37 = vsub.f32 %v1989_v10, %v1997_v34 }
 0x8d3   :  { %v1998_v38 = vsub.f32 %v1988_v14, %v1996_v36 }
 0x8d4   :  { %v2001_v41 = vmul.f32 %v1999_v37, %v1999_v37 }
 0x8d5   :  { %v2000_v39 = vmul.f32 %v1998_v38, %v1998_v38 }
 0x8d6   :  { %v2005_v1 = vsel %vm139_vm3, %v2001_v41, 0.0 }
 0x8d7   :  { %v2002_v40 = vsel %vm139_vm3, %v2000_v39, 0.0 }
 0x8d8   :  { %2003 = vadd.xlane.f32.xlu0 %v2002_v40 }
 0x8dc   :  { %2006 = vadd.xlane.f32.xlu0 %v2005_v1 }
 0x965   :  { %v2004_v49 = vpop.xlane.xlu0 %2003 }
 0x966   :  { %v2008_v50 = vmul.f32 0.03125, %v2004_v49 }
 0x968   :  { %v2010_v52 = vadd.f32 1e-12, %v2008_v50 }
 0x969   :  { %v2007_v54 = vpop.xlane.xlu0 %2006 }
 0x96a   :  { %5207 = vrsqrt.f32 %v2010_v52  ;;  %v2009_v56 = vmul.f32 0.03125, %v2007_v54 }
 0x96c   :  { %v2011_v57 = vadd.f32 1e-12, %v2009_v56 }
 0x96e   :  { %5209 = vrsqrt.f32 %v2011_v57 }
 0x974   :  { %v5208_v61 = vpop.eup %5207 }
 0x975   :  { %v2014_v62 = vmul.f32 %v5208_v61, %v1998_v38 }
 0x977   :  { %v2020_v3 = vmul.f32 %v2019_v60, %v2014_v62 }
 0x978   :  { %v5210_v4 = vpop.eup %5209 }
 0x979   :  { %v2015_v6 = vmul.f32 %v5210_v4, %v1999_v37  ;;  %v2026_v8 = vadd.f32 %v2025_v0, %v2020_v3 }
 0x97b   :  { %v2021_v9 = vmul.f32 %v2019_v60, %v2015_v6  ;;  %4880 = vmatprep.mubr.msk.f32.mxu0 %vm139_vm3, %v2026_v8 }
 0x97d   :  { %v2027_v17 = vadd.f32 %v2025_v0, %v2021_v9 }
 0x97f   :  { %4881 = vmatmul.mubr.msk.f32.vlgmr.msra.gmra.mrb[18].mxu0 %vm139_vm3, %v2027_v17 }
 0xa52   :  { %v4882_v30 = vpop.f32.mrb[18].mxu0 }
 0xa53   :  { %v2114_v31 = vadd.f32 %v4882_v30, %v2035_v29  ;;  %v2108_v7 = vpop.f32.mrb[19].mxu0  ;;  %v2258_v30 = vsub.s32 6, %v5351_v51 }
 0xa54   :  { %v2109_v32 = vadd.f32 %v2108_v7, %v2035_v29 }
 0xa55   :  { %v2120_v11 = vmul.f32 0.044715, %v2114_v31  ;;  %v2118_v63 = vmul.f32 0.5, %v2114_v31  ;;  %v2259_v7 = vrot.slane %v5369_v2, %v2258_v30 }
 0xa56   :  { %v2119_v10 = vmul.f32 0.044715, %v2109_v32  ;;  %v2117_v41 = vmul.f32 0.5, %v2109_v32 }
 0xa57   :  { %v2122_v14 = vmul.f32 %v2120_v11, %v2114_v31 }
 0xa58   :  { %v2121_v5 = vmul.f32 %v2119_v10, %v2109_v32 }
 0xa59   :  { %v2124_v12 = vmul.f32 %v2122_v14, %v2114_v31 }
 0xa5a   :  { %v2123_v33 = vmul.f32 %v2121_v5, %v2109_v32 }
 0xa5b   :  { %v2126_v34 = vadd.f32 %v2124_v12, %v2114_v31  ;;  %v2264_v31 = vsub.s32 7, %v5351_v51  ;;  %v4326_v51 = vld [vmem:[#allocation2 + $0x1e0] sm:$0xff] }
 0xa5c   :  { %v2125_v35 = vadd.f32 %v2123_v33, %v2109_v32 }
 0xa5d   :  { %v2128_v36 = vmul.f32 0.7978846, %v2126_v34  ;;  %v2265_v5 = vrot.slane %v5369_v2, %v2264_v31 }
 0xa5e   :  { %v2127_v37 = vmul.f32 0.7978846, %v2125_v35 }
 0xa5f   :  { %5211 = vtanh.f32 %v2128_v36  ;;  %v5633_v36 = vld [vmem:[#allocation2 + $0x8] sm:$0xff] }
 0xa60   :  { %5213 = vtanh.f32 %v2127_v37  ;;  %v2275_v2 = vrot.slane %v5633_v36, %v5354_v53 }
 0xa69   :  { %v5212_v38 = vpop.eup %5211 }
 0xa6a   :  { %v5214_v39 = vpop.eup %5213  ;;  %v2132_v40 = vadd.f32 1.0, %v5212_v38 }
 0xa6b   :  { %v2131_v1 = vadd.f32 1.0, %v5214_v39 }
 0xa6c   :  { %v2134_v44 = vmul.f32 %v2132_v40, %v2118_v63 }
 0xa6d   :  { %v2133_v42 = vmul.f32 %v2131_v1, %v2117_v41 }
 0xa6f   :  { %4899 = vmatprep.mubr.msk.f32.mxu1 %vm57_vm0, %v2133_v42 }
 0xa70   :  { %4900 = vmatmul.mubr.msk.f32.vlgmr.msra.gmra.mrb[26].mxu1 %vm57_vm0, %v2134_v44 }
 0xa71   :  { %4920 = vmatprep.mubr.msk.f32.mxu1 %vm5298_vm4, %v5294_v15 }
 0xb43   :  { %v4901_v48 = vpop.f32.mrb[26].mxu1 }
 0xb44   :  { %v2225_v49 = vadd.f32 %v4901_v48, %v2146_v47  ;;  %v2219_v50 = vpop.f32.mrb[27].mxu1 }
 0xb45   :  { %v2220_v52 = vadd.f32 %v2219_v50, %v2146_v47 }
 0xb46   :  { %v2229_v54 = vadd.f32 %v2225_v49, %v2027_v17 }
 0xb47   :  { %v2228_v56 = vadd.f32 %v2220_v52, %v2026_v8  ;;  %v2268_v8 = vld [vmem:[#allocation2 + $0x108] sm:$0xff] }
 0xb48   :  { %v2233_v57 = vsel %vm139_vm3, %v2229_v54, 0.0  ;;  %v5113_v21 = vpack.c.bf16 %v2269_v20, %v2268_v8 }
 0xb49   :  { %2234 = vadd.xlane.f32.xlu0 %v2233_v57  ;;  %v2230_v60 = vsel %vm139_vm3, %v2228_v56, 0.0 }
 0xb4a   :  { %2231 = vadd.xlane.f32.xlu1 %v2230_v60  ;;  %5114 = vmatprep.subr.bf16.mxu0 %v5113_v21 }
 0xb4b   :  { %5116 = vmatpush3.bf16.msra.mxu0 %v5113_v21 }
 0xb4c   :  { %5118 = vmatprep.subr.bf16.mxu0 %v5117_v24 }
 0xb4f   :  { %5120 = vmatpush3.bf16.msra.mxu0 %v5117_v24 }
 0xb50   :  { %4913 = vmatprep.subr.mxu0 %v5294_v15 }
 0xbd6   :  { %v2235_v61 = vpop.xlane.xlu0 %2234 }
 0xbd7   :  { %v2237_v62 = vmul.f32 0.03125, %v2235_v61  ;;  %v2232_v0 = vpop.xlane.xlu1 %2231 }
 0xbd8   :  { %v2236_v3 = vmul.f32 0.03125, %v2232_v0 }
 0xbd9   :  { %v2239_v4 = vsub.f32 %v2229_v54, %v2237_v62 }
 0xbda   :  { %v2238_v6 = vsub.f32 %v2228_v56, %v2236_v3 }
 0xbdb   :  { %v2241_v9 = vmul.f32 %v2239_v4, %v2239_v4 }
 0xbdc   :  { %v2240_v18 = vmul.f32 %v2238_v6, %v2238_v6 }
 0xbdd   :  { %v2245_v19 = vsel %vm139_vm3, %v2241_v9, 0.0 }
 0xbde   :  { %2246 = vadd.xlane.f32.xlu0 %v2245_v19  ;;  %v2242_v17 = vsel %vm139_vm3, %v2240_v18, 0.0 }
 0xbdf   :  { %2243 = vadd.xlane.f32.xlu1 %v2242_v17 }
 0xc6b   :  { %v2247_v25 = vpop.xlane.xlu0 %2246 }
 0xc6c   :  { %v2249_v26 = vmul.f32 0.03125, %v2247_v25  ;;  %v2244_v13 = vpop.xlane.xlu1 %2243 }
 0xc6d   :  { %v2248_v16 = vmul.f32 0.03125, %v2244_v13 }
 0xc6e   :  { %v2251_v27 = vadd.f32 1e-12, %v2249_v26 }
 0xc6f   :  { %v2250_v29 = vadd.f32 1e-12, %v2248_v16 }
 0xc70   :  { %5215 = vrsqrt.f32 %v2251_v27 }
 0xc71   :  { %5217 = vrsqrt.f32 %v2250_v29 }
 0xc7a   :  { %v5216_v32 = vpop.eup %5215 }
 0xc7b   :  { %v5218_v11 = vpop.eup %5217  ;;  %v2255_v10 = vmul.f32 %v5216_v32, %v2239_v4 }
 0xc7c   :  { %v2254_v14 = vmul.f32 %v5218_v11, %v2238_v6 }
 0xc7d   :  { %v2261_v12 = vmul.f32 %v2259_v7, %v2255_v10 }
 0xc7e   :  { %v2260_v33 = vmul.f32 %v2259_v7, %v2254_v14 }
 0xc7f   :  { %v5625_v35 = vadd.f32 %v2265_v5, %v2261_v12 }
 0xc80   :  { %v5623_v34 = vadd.f32 %v2265_v5, %v2260_v33 }
 0xc82   :  { %4910 = vmatprep.mubr.msk.f32.mxu0 %vm139_vm3, %v5623_v34 }
 0xc83   :  { %4911 = vmatmul.mubr.msk.f32.vlgmr.msra.gmra.mrb[20].mxu0 %vm139_vm3, %v5625_v35 }
 0xc84   :  { %4915 = vmatprep.mubr.msk.f32.mxu0 %vm5298_vm4, %v5294_v15 }
 0xd56   :  { %v4912_v37 = vpop.f32.mrb[20].mxu0 }
 0xd57   :  { %v5637_v38 = vadd.f32 %v4912_v37, %v2275_v2  ;;  %v2348_v39 = vpop.f32.mrb[21].mxu0 }
 0xd58   :  { %v5639_v40 = vadd.f32 %v2348_v39, %v2275_v2 }
 0xd59   :  { %2377 = vrot.lane.b32.xlu0 %v5637_v38, %s5295_s0  ;;  %v2358_v41 = vmul.f32 0.35355338, %v5637_v38 }
 0xd5a   :  { %2375 = vrot.lane.b32.xlu1 %v5639_v40, %s5295_s0  ;;  %v2357_v53 = vmul.f32 0.35355338, %v5639_v40 }
 0xd5d   :  { %2383 = vrot.lane.b32.xlu0 %v5639_v40, %s5296_s2 }
 0xd5e   :  { %2379 = vrot.lane.b32.xlu1 %v5639_v40, %s5297_s30 }
 0xd61   :  { %2387 = vrot.lane.b32.xlu0 %v5639_v40, %s5299_s4 }
 0xd62   :  { %2381 = vrot.lane.b32.xlu1 %v5637_v38, %s5297_s30 }
 0xd65   :  { %2361 = vrot.lane.b32.xlu0 %v2357_v53, %s5295_s0 }
 0xd66   :  { %2385 = vrot.lane.b32.xlu1 %v5637_v38, %s5296_s2 }
 0xd69   :  { %2365 = vrot.lane.b32.xlu0 %v2357_v53, %s5297_s30 }
 0xd6a   :  { %2463 = vrot.lane.b32.xlu1 %v5637_v38, %s5299_s4 }
 0xd6e   :  { %2363 = vrot.lane.b32.xlu1 %v2358_v41, %s5295_s0 }
 0xd72   :  { %2367 = vrot.lane.b32.xlu1 %v2358_v41, %s5297_s30 }
 0xdcb   :  { %v5663_v1 = vpop.permute.xlu0 %2377 }
 0xdcc   :  { %2615 = vrot.lane.b32.xlu1 %v5663_v1, %s5299_s4  ;;  %v5667_v63 = vpop.permute.xlu1 %2375 }
 0xdcd   :  { %2539 = vrot.lane.b32.xlu0 %v5667_v63, %s5299_s4 }
 0xdcf   :  { %v5671_v42 = vpop.permute.xlu0 %2383 }
 0xdd0   :  { %v5673_v44 = vpop.permute.xlu1 %2379 }
 0xdd1   :  { %2691 = vrot.lane.b32.xlu0 %v5673_v44, %s5299_s4 }
 0xdd3   :  { %v2388_v47 = vpop.permute.xlu0 %2387 }
 0xdd4   :  { %4914 = vmatpush3.xpose.msk.msra.mxu0 %vm337_vm5, %v2388_v47  ;;  %v5678_v48 = vpop.permute.xlu1 %2381 }
 0xdd5   :  { %2767 = vrot.lane.b32.xlu1 %v5678_v48, %s5299_s4  ;;  %2843 = vrot.lane.b32.xlu0 %v5671_v42, %s5299_s4 }
 0xdd6   :  { %4923 = vmatprep.subr.mxu0 %v5294_v15 }
 0xdd7   :  { %4916 = vmatmul.mubr.msk.f32.vlgmr.msra.gmra.mrb[22].mxu0 %vm337_vm5, %v2357_v53  ;;  %v2362_v54 = vpop.permute.xlu0 %2361 }
 0xdd8   :  { %v5686_v49 = vpop.permute.xlu1 %2385  ;;  %4925 = vmatprep.mubr.msk.f32.mxu0 %vm5298_vm4, %v5294_v15 }
 0xdd9   :  { %2919 = vrot.lane.b32.xlu1 %v5686_v49, %s5299_s4  ;;  %2369 = vrot.lane.b32.xlu0 %v2357_v53, %s5296_s2 }
 0xddb   :  { %v2366_v57 = vpop.permute.xlu0 %2365 }
 0xddc   :  { %v2464_v50 = vpop.permute.xlu1 %2463 }
 0xddd   :  { %2371 = vrot.lane.b32.xlu1 %v2358_v41, %s5296_s2  ;;  %4919 = vmatpush3.xpose.msk.msra.mxu1 %vm337_vm5, %v2464_v50 }
 0xdde   :  { %4928 = vmatprep.subr.mxu1 %v5294_v15 }
 0xde0   :  { %4921 = vmatmul.mubr.msk.f32.vlgmr.msra.gmra.mrb[28].mxu1 %vm337_vm5, %v2358_v41  ;;  %v2364_v52 = vpop.permute.xlu1 %2363 }
 0xde1   :  { %4930 = vmatprep.mubr.msk.f32.mxu1 %vm5298_vm4, %v5294_v15 }
 0xde4   :  { %v2368_v56 = vpop.permute.xlu1 %2367 }
 0xe3e   :  { %v2616_v60 = vpop.permute.xlu1 %2615 }
 0xe3f   :  { %4929 = vmatpush3.xpose.msk.msra.mxu1 %vm337_vm5, %v2616_v60  ;;  %v2540_v61 = vpop.permute.xlu0 %2539 }
 0xe40   :  { %4924 = vmatpush3.xpose.msk.msra.mxu0 %vm337_vm5, %v2540_v61  ;;  %4938 = vmatprep.subr.mxu1 %v5294_v15 }
 0xe41   :  { %4933 = vmatprep.subr.mxu0 %v5294_v15 }
 0xe42   :  { %4931 = vmatmul.mubr.msk.f32.vlgmr.msra.gmra.mrb[30].mxu1 %vm337_vm5, %v2364_v52 }
 0xe43   :  { %v2692_v62 = vpop.permute.xlu0 %2691  ;;  %4926 = vmatmul.mubr.msk.f32.vlgmr.msra.gmra.mrb[24].mxu0 %vm337_vm5, %v2362_v54  ;;  %4940 = vmatprep.mubr.msk.f32.mxu1 %vm5298_vm4, %v5294_v15 }
 0xe44   :  { %4934 = vmatpush3.xpose.msk.msra.mxu0 %vm337_vm5, %v2692_v62  ;;  %4935 = vmatprep.mubr.msk.f32.mxu0 %vm5298_vm4, %v5294_v15 }
 0xe45   :  { %4943 = vmatprep.subr.mxu0 %v5294_v15 }
 0xe47   :  { %v2768_v0 = vpop.permute.xlu1 %2767  ;;  %v2844_v3 = vpop.permute.xlu0 %2843  ;;  %4936 = vmatmul.mubr.msk.f32.vlgmr.msra.gmra.mrb[26].mxu0 %vm337_vm5, %v2366_v57 }
 0xe48   :  { %4939 = vmatpush3.xpose.msk.msra.mxu1 %vm337_vm5, %v2768_v0  ;;  %4944 = vmatpush3.xpose.msk.msra.mxu0 %vm337_vm5, %v2844_v3 }
 0xe49   :  { %4948 = vmatprep.subr.mxu1 %v5294_v15  ;;  %4945 = vmatprep.mubr.msk.f32.mxu0 %vm5298_vm4, %v5294_v15 }
 0xe4a   :  { %4953 = vmatprep.subr.mxu0 %v5294_v15 }
 0xe4b   :  { %4941 = vmatmul.mubr.msk.f32.vlgmr.msra.gmra.mrb[32].mxu1 %vm337_vm5, %v2368_v56  ;;  %v2920_v4 = vpop.permute.xlu1 %2919  ;;  %v2370_v6 = vpop.permute.xlu0 %2369 }
 0xe4c   :  { %4946 = vmatmul.mubr.msk.f32.vlgmr.msra.gmra.mrb[28].mxu0 %vm337_vm5, %v2370_v6  ;;  %4949 = vmatpush3.xpose.msk.msra.mxu1 %vm337_vm5, %v2920_v4 }
 0xe4d   :  { %4950 = vmatprep.mubr.msk.f32.mxu1 %vm5298_vm4, %v5294_v15  ;;  %4958 = vmatprep.subr.mxu1 %v5294_v15 }
 0xe4e   :  { %4955 = vmatprep.mubr.msk.f32.mxu0 %vm5298_vm4, %v5294_v15 }
 0xe4f   :  { %v2372_v9 = vpop.permute.xlu1 %2371 }
 0xe50   :  { %4951 = vmatmul.mubr.msk.f32.vlgmr.msra.gmra.mrb[34].mxu1 %vm337_vm5, %v2372_v9 }
 0xe51   :  { %4960 = vmatprep.mubr.msk.f32.mxu1 %vm5298_vm4, %v5294_v15 }
 0xeaa   :  { %v2459_v18 = vpop.f32.mrb[22].mxu0 }
 0xeab   :  { %v2460_v19 = vadd.f32 %v2459_v18, %v5474_v43  ;;  %v4917_v17 = vpop.f32.mrb[23].mxu0 }
 0xead   :  { %v2995_v8 = vsel %vm337_vm5, %v2460_v19, -inf }
 0xeae   :  { %2996 = vmax.xlane.f32.xlu0 %v2995_v8 }
 0xeb3   :  { %v2535_v20 = vpop.f32.mrb[28].mxu1 }
 0xeb4   :  { %v2536_v21 = vadd.f32 %v2535_v20, %v5477_v45  ;;  %v4922_v22 = vpop.f32.mrb[29].mxu1 }
 0xeb6   :  { %v2998_v23 = vsel %vm337_vm5, %v2536_v21, -inf }
 0xeb7   :  { %2999 = vmax.xlane.f32.xlu1 %v2998_v23 }
 0xf15   :  { %v2687_v24 = vpop.f32.mrb[30].mxu1 }
 0xf16   :  { %v2611_v25 = vpop.f32.mrb[24].mxu0  ;;  %v4932_v26 = vpop.f32.mrb[31].mxu1  ;;  %v2688_v27 = vadd.f32 %v2687_v24, %v5477_v45 }
 0xf17   :  { %v2612_v13 = vadd.f32 %v2611_v25, %v5474_v43  ;;  %v4927_v16 = vpop.f32.mrb[25].mxu0 }
 0xf18   :  { %v3004_v10 = vsel %vm337_vm5, %v2688_v27, -inf }
 0xf19   :  { %v3001_v29 = vsel %vm337_vm5, %v2612_v13, -inf }
 0xf1a   :  { %3002 = vmax.xlane.f32.xlu0 %v3001_v29  ;;  %v2763_v7 = vpop.f32.mrb[26].mxu0 }
 0xf1b   :  { %v2764_v32 = vadd.f32 %v2763_v7, %v5474_v43  ;;  %v4937_v11 = vpop.f32.mrb[27].mxu0 }
 0xf1d   :  { %v3007_v14 = vsel %vm337_vm5, %v2764_v32, -inf }
 0xf1e   :  { %v2839_v5 = vpop.f32.mrb[32].mxu1  ;;  %3005 = vmax.xlane.f32.xlu0 %v3004_v10  ;;  %3008 = vmax.xlane.f32.xlu1 %v3007_v14 }
 0xf1f   :  { %v2840_v12 = vadd.f32 %v2839_v5, %v5477_v45  ;;  %v4942_v33 = vpop.f32.mrb[33].mxu1  ;;  %v2915_v2 = vpop.f32.mrb[28].mxu0 }
 0xf20   :  { %v2916_v37 = vadd.f32 %v2915_v2, %v5474_v43  ;;  %v4947_v39 = vpop.f32.mrb[29].mxu0 }
 0xf21   :  { %v3010_v53 = vsel %vm337_vm5, %v2840_v12, -inf }
 0xf22   :  { %3011 = vmax.xlane.f32.xlu0 %v3010_v53  ;;  %v3013_v41 = vsel %vm337_vm5, %v2916_v37, -inf }
 0xf23   :  { %v2991_v47 = vpop.f32.mrb[34].mxu1  ;;  %3014 = vmax.xlane.f32.xlu1 %v3013_v41 }
 0xf24   :  { %v2992_v50 = vadd.f32 %v2991_v47, %v5477_v45  ;;  %v4952_v52 = vpop.f32.mrb[35].mxu1 }
 0xf26   :  { %v3016_v54 = vsel %vm337_vm5, %v2992_v50, -inf }
 0xf27   :  { %3017 = vmax.xlane.f32.xlu0 %v3016_v54 }
 0xf34   :  { %3083 = vrot.lane.b32.xlu1 %v5639_v40, %s5301_s1 }
 0xf38   :  { %3235 = vrot.lane.b32.xlu1 %v5667_v63, %s5301_s1 }
 0xf3b   :  { %v2997_v56 = vpop.xlane.xlu0 %2996 }
 0xf3c   :  { %3311 = vrot.lane.b32.xlu1 %v5663_v1, %s5301_s1  ;;  %v3019_v57 = vsub.f32 %v2460_v19, %v2997_v56 }
 0xf3d   :  { %3159 = vrot.lane.b32.xlu0 %v5637_v38, %s5301_s1 }
 0xf3e   :  { %v3027_v60 = vmul.f32 1.442695, %v3019_v57 }
 0xf40   :  { %3463 = vrot.lane.b32.xlu1 %v5678_v48, %s5301_s1 }
 0xf41   :  { %3387 = vrot.lane.b32.xlu0 %v5673_v44, %s5301_s1 }
 0xf44   :  { %v3000_v43 = vpop.xlane.xlu1 %2999 }
 0xf45   :  { %v3020_v45 = vsub.f32 %v2536_v21, %v3000_v43 }
 0xf47   :  { %v3029_v40 = vmul.f32 1.442695, %v3020_v45 }
 0xf49   :  { %5219 = vpow2.f32 %v3029_v40 }
 0xf4a   :  { %5221 = vpow2.f32 %v3027_v60 }
 0xf53   :  { %v5757_v63 = vpop.eup %5219 }
 0xf54   :  { %v3046_v1 = vsel %vm337_vm5, %v5757_v63, 0.0  ;;  %v5761_v38 = vpop.eup %5221 }
 0xf55   :  { %v3043_v48 = vsel %vm337_vm5, %v5761_v38, 0.0 }
 0xf60   :  { %3047 = vadd.xlane.f32.xlu0 %v3046_v1 }
 0xf64   :  { %3044 = vadd.xlane.f32.xlu1 %v3043_v48 }
 0xfa7   :  { %v3003_v44 = vpop.xlane.xlu0 %3002 }
 0xfa8   :  { %v3021_v61 = vsub.f32 %v2612_v13, %v3003_v44 }
 0xfaa   :  { %v3031_v62 = vmul.f32 1.442695, %v3021_v61 }
 0xfab   :  { %v3006_v0 = vpop.xlane.xlu0 %3005  ;;  %v3009_v3 = vpop.xlane.xlu1 %3008 }
 0xfac   :  { %5223 = vpow2.f32 %v3031_v62  ;;  %v3022_v4 = vsub.f32 %v2688_v27, %v3006_v0  ;;  %v3023_v6 = vsub.f32 %v2764_v32, %v3009_v3  ;;  %v3691_v3 = vld [vmem:[#allocation2 + $0x128] sm:$0xff] }
 0xfae   :  { %v3033_v9 = vmul.f32 1.442695, %v3022_v4  ;;  %v3035_v18 = vmul.f32 1.442695, %v3023_v6 }
 0xfaf   :  { %v3012_v19 = vpop.xlane.xlu0 %3011 }
 0xfb0   :  { %5225 = vpow2.f32 %v3033_v9  ;;  %v3024_v17 = vsub.f32 %v2840_v12, %v3012_v19  ;;  %v3015_v8 = vpop.xlane.xlu1 %3014 }
 0xfb1   :  { %5227 = vpow2.f32 %v3035_v18  ;;  %v3025_v20 = vsub.f32 %v2916_v37, %v3015_v8  ;;  %v3692_v8 = vld [vmem:[#allocation2 + $0x130] sm:$0xff] }
 0xfb2   :  { %v3037_v21 = vmul.f32 1.442695, %v3024_v17 }
 0xfb3   :  { %v3039_v22 = vmul.f32 1.442695, %v3025_v20  ;;  %v3693_v20 = vld [vmem:[#allocation2 + $0x138] sm:$0xff] }
 0xfb4   :  { %5229 = vpow2.f32 %v3037_v21  ;;  %v3018_v23 = vpop.xlane.xlu0 %3017  ;;  %v3084_v24 = vpop.permute.xlu1 %3083  ;;  %v3694_v21 = vld [vmem:[#allocation2 + $0x140] sm:$0xff] }
 0xfb5   :  { %5231 = vpow2.f32 %v3039_v22  ;;  %v3026_v25 = vsub.f32 %v2992_v50, %v3018_v23  ;;  %4954 = vmatpush3.msra.mxu0 %v3084_v24 }
 0xfb6   :  { %v5224_v26 = vpop.eup %5223  ;;  %4963 = vmatprep.subr.mxu0 %v5294_v15 }
 0xfb7   :  { %v3041_v13 = vmul.f32 1.442695, %v3026_v25  ;;  %v3049_v16 = vsel %vm337_vm5, %v5224_v26, 0.0 }
 0xfb8   :  { %v3160_v27 = vpop.permute.xlu0 %3159  ;;  %3050 = vadd.xlane.f32.xlu1 %v3049_v16  ;;  %v3236_v37 = vpop.permute.xlu1 %3235 }
 0xfb9   :  { %5233 = vpow2.f32 %v3041_v13  ;;  %4959 = vmatpush3.msra.mxu1 %v3160_v27 }
 0xfba   :  { %v5226_v29 = vpop.eup %5225  ;;  %4968 = vmatprep.subr.mxu1 %v5294_v15 }
 0xfbb   :  { %v5228_v7 = vpop.eup %5227  ;;  %v3052_v32 = vsel %vm337_vm5, %v5226_v29, 0.0 }
 0xfbc   :  { %3053 = vadd.xlane.f32.xlu0 %v3052_v32  ;;  %v3055_v11 = vsel %vm337_vm5, %v5228_v7, 0.0  ;;  %v3312_v39 = vpop.permute.xlu1 %3311  ;;  %v3388_v53 = vpop.permute.xlu0 %3387 }
 0xfbd   :  { %3056 = vadd.xlane.f32.xlu1 %v3055_v11 }
 0xfbe   :  { %v5230_v10 = vpop.eup %5229 }
 0xfbf   :  { %v5232_v14 = vpop.eup %5231  ;;  %v3058_v5 = vsel %vm337_vm5, %v5230_v10, 0.0 }
 0xfc0   :  { %3059 = vadd.xlane.f32.xlu0 %v3058_v5  ;;  %v3061_v12 = vsel %vm337_vm5, %v5232_v14, 0.0  ;;  %v3464_v41 = vpop.permute.xlu1 %3463 }
 0xfc1   :  { %3062 = vadd.xlane.f32.xlu1 %v3061_v12 }
 0xfc3   :  { %v5772_v33 = vpop.eup %5233 }
 0xfc4   :  { %v3064_v2 = vsel %vm337_vm5, %v5772_v33, 0.0 }
 0xfc5   :  { %3065 = vadd.xlane.f32.xlu0 %v3064_v2 }
 0xfd2   :  { %3615 = vrot.lane.b32.xlu1 %v5686_v49, %s5301_s1 }
 0xfdb   :  { %3539 = vrot.lane.b32.xlu0 %v5671_v42, %s5301_s1 }
 0xfed   :  { %v3048_v47 = vpop.xlane.xlu0 %3047 }
 0xfee   :  { %5235 = vrcp.f32 %v3048_v47 }
 0xff1   :  { %v3045_v50 = vpop.xlane.xlu1 %3044 }
 0xff2   :  { %5237 = vrcp.f32 %v3045_v50 }
 0xff8   :  { %v5236_v52 = vpop.eup %5235 }
 0xff9   :  { %v3076_v54 = vmul.f32 %v5236_v52, %v5757_v63 }
 0xffb   :  { %4961 = vmatmul.mubr.msk.f32.vlgmr.msra.gmra.mrb[36].mxu1 %vm337_vm5, %v3076_v54 }
 0xffc   :  { %v5238_v43 = vpop.eup %5237  ;;  %4969 = vmatpush3.msra.mxu1 %v3312_v39  ;;  %4970 = vmatprep.mubr.msk.f32.mxu1 %vm5298_vm4, %v5294_v15 }
 0xffd   :  { %v3075_v42 = vmul.f32 %v5238_v43, %v5761_v38  ;;  %4978 = vmatprep.subr.mxu1 %v5294_v15 }
 0xfff   :  { %4956 = vmatmul.mubr.msk.f32.vlgmr.msra.gmra.mrb[30].mxu0 %vm337_vm5, %v3075_v42 }
0x1000   :  { %4964 = vmatpush3.msra.mxu0 %v3236_v37  ;;  %4965 = vmatprep.mubr.msk.f32.mxu0 %vm5298_vm4, %v5294_v15 }
0x1001   :  { %4973 = vmatprep.subr.mxu0 %v5294_v15 }
0x1045   :  { %v3051_v49 = vpop.xlane.xlu1 %3050 }
0x1046   :  { %5239 = vrcp.f32 %v3051_v49 }
0x1049   :  { %v3054_v45 = vpop.xlane.xlu0 %3053 }
0x104a   :  { %5241 = vrcp.f32 %v3054_v45  ;;  %v3057_v56 = vpop.xlane.xlu1 %3056 }
0x104b   :  { %5243 = vrcp.f32 %v3057_v56 }
0x104d   :  { %v3060_v57 = vpop.xlane.xlu0 %3059 }
0x104e   :  { %5245 = vrcp.f32 %v3060_v57  ;;  %v3063_v40 = vpop.xlane.xlu1 %3062 }
0x104f   :  { %5247 = vrcp.f32 %v3063_v40 }
0x1050   :  { %v5240_v60 = vpop.eup %5239 }
0x1051   :  { %v3077_v63 = vmul.f32 %v5240_v60, %v5224_v26  ;;  %v4036_v60 = vrot.slane %v5633_v36, %v5357_v55 }
0x1052   :  { %v3066_v1 = vpop.xlane.xlu0 %3065  ;;  %v3616_v18 = vpop.permute.xlu1 %3615 }
0x1053   :  { %5249 = vrcp.f32 %v3066_v1  ;;  %4966 = vmatmul.mubr.msk.f32.vlgmr.msra.gmra.mrb[32].mxu0 %vm337_vm5, %v3077_v63 }
0x1054   :  { %v5242_v38 = vpop.eup %5241  ;;  %4974 = vmatpush3.msra.mxu0 %v3388_v53  ;;  %4975 = vmatprep.mubr.msk.f32.mxu0 %vm5298_vm4, %v5294_v15 }
0x1055   :  { %v5244_v48 = vpop.eup %5243  ;;  %v3078_v44 = vmul.f32 %v5242_v38, %v5226_v29  ;;  %4983 = vmatprep.subr.mxu0 %v5294_v15 }
0x1056   :  { %v3079_v61 = vmul.f32 %v5244_v48, %v5228_v7  ;;  %v3540_v62 = vpop.permute.xlu0 %3539 }
0x1057   :  { %4971 = vmatmul.mubr.msk.f32.vlgmr.msra.gmra.mrb[38].mxu1 %vm337_vm5, %v3078_v44 }
0x1058   :  { %v5246_v0 = vpop.eup %5245  ;;  %4976 = vmatmul.mubr.msk.f32.vlgmr.msra.gmra.mrb[34].mxu0 %vm337_vm5, %v3079_v61  ;;  %4979 = vmatpush3.msra.mxu1 %v3464_v41 }
0x1059   :  { %v5248_v4 = vpop.eup %5247  ;;  %v3080_v6 = vmul.f32 %v5246_v0, %v5230_v10  ;;  %4984 = vmatpush3.msra.mxu0 %v3540_v62  ;;  %4980 = vmatprep.mubr.msk.f32.mxu1 %vm5298_vm4, %v5294_v15 }
0x105a   :  { %v3081_v9 = vmul.f32 %v5248_v4, %v5232_v14  ;;  %4988 = vmatprep.subr.mxu1 %v5294_v15  ;;  %4985 = vmatprep.mubr.msk.f32.mxu0 %vm5298_vm4, %v5294_v15 }
0x105b   :  { %4981 = vmatmul.mubr.msk.f32.vlgmr.msra.gmra.mrb[40].mxu1 %vm337_vm5, %v3080_v6  ;;  %4993 = vmatprep.subr.mxu0 %v3691_v3 }
0x105c   :  { %4989 = vmatpush3.msra.mxu1 %v3616_v18  ;;  %4986 = vmatmul.mubr.msk.f32.vlgmr.msra.gmra.mrb[36].mxu0 %vm337_vm5, %v3081_v9 }
0x105d   :  { %v5250_v19 = vpop.eup %5249  ;;  %4990 = vmatprep.mubr.msk.f32.mxu1 %vm5298_vm4, %v5294_v15  ;;  %4994 = vmatpush3.msra.mxu0 %v3691_v3 }
0x105e   :  { %v3082_v17 = vmul.f32 %v5250_v19, %v5772_v33  ;;  %4998 = vmatprep.subr.mxu1 %v3692_v8  ;;  %5003 = vmatprep.subr.mxu0 %v3693_v20 }
0x1060   :  { %4991 = vmatmul.mubr.msk.f32.vlgmr.msra.gmra.mrb[42].mxu1 %vm337_vm5, %v3082_v17 }
0x1061   :  { %4999 = vmatpush3.msra.mxu1 %v3692_v8 }
0x1062   :  { %5008 = vmatprep.subr.mxu1 %v3694_v21 }
0x10ce   :  { %v3231_v22 = vpop.f32.mrb[36].mxu1 }
0x10cf   :  { %v4962_v23 = vpop.f32.mrb[37].mxu1 }
0x10d0   :  { %v4080_v23 = vld [vmem:[#allocation2 + $0x150] sm:$0xff] }
0x10d2   :  { %v3155_v24 = vpop.f32.mrb[30].mxu0 }
0x10d3   :  { %v4957_v25 = vpop.f32.mrb[31].mxu0  ;;  %4995 = vmatprep.mubr.msk.f32.mxu0 %vm337_vm5, %v3155_v24 }
0x10d4   :  { %4996 = vmatmul.mubr.msk.f32.vlgmr.msra.gmra.mrb[38].mxu0 %vm337_vm5, %v3231_v22  ;;  %v4081_v25 = vld [vmem:[#allocation2 + $0x158] sm:$0xff] }
0x10d5   :  { %5004 = vmatpush3.msra.mxu0 %v3693_v20 }
0x1126   :  { %v3307_v26 = vpop.f32.mrb[32].mxu0 }
0x1127   :  { %v4967_v13 = vpop.f32.mrb[33].mxu0  ;;  %5000 = vmatprep.mubr.msk.f32.mxu1 %vm337_vm5, %v3307_v26  ;;  %v4082_v26 = vld [vmem:[#allocation2 + $0x160] sm:$0xff] }
0x1128   :  { %v5125_v13 = vpack.c.bf16 %v4082_v26, %v4081_v25 }
0x112a   :  { %v3383_v16 = vpop.f32.mrb[38].mxu1 }
0x112b   :  { %v3459_v27 = vpop.f32.mrb[34].mxu0  ;;  %v4972_v29 = vpop.f32.mrb[39].mxu1  ;;  %5001 = vmatmul.mubr.msk.f32.vlgmr.msra.gmra.mrb[44].mxu1 %vm337_vm5, %v3383_v16 }
0x112c   :  { %v4977_v7 = vpop.f32.mrb[35].mxu0  ;;  %5005 = vmatprep.mubr.msk.f32.mxu0 %vm337_vm5, %v3459_v27  ;;  %5009 = vmatpush3.msra.mxu1 %v3694_v21 }
0x112e   :  { %v3535_v32 = vpop.f32.mrb[40].mxu1 }
0x112f   :  { %v4982_v11 = vpop.f32.mrb[41].mxu1  ;;  %v3611_v10 = vpop.f32.mrb[36].mxu0  ;;  %5006 = vmatmul.mubr.msk.f32.vlgmr.msra.gmra.mrb[40].mxu0 %vm337_vm5, %v3535_v32 }
0x1130   :  { %v4987_v14 = vpop.f32.mrb[37].mxu0  ;;  %5010 = vmatprep.mubr.msk.f32.mxu1 %vm337_vm5, %v3611_v10  ;;  %v4070_v10 = vrot.slane %v5633_v36, %v5586_v58 }
0x1133   :  { %v3687_v5 = vpop.f32.mrb[42].mxu1 }
0x1134   :  { %v4992_v12 = vpop.f32.mrb[43].mxu1  ;;  %5011 = vmatmul.mubr.msk.f32.vlgmr.msra.gmra.mrb[46].mxu1 %vm337_vm5, %v3687_v5 }
0x1135   :  { %v4076_v12 = vrot.slane %v5633_v36, %v5589_v59 }
0x11a7   :  { %v4997_v33 = vpop.f32.mrb[38].mxu0 }
0x11a8   :  { %v3767_v2 = vpop.f32.mrb[39].mxu0  ;;  %v4026_v39 = vsel %vm139_vm3, %v4997_v33, 0.0 }
0x11a9   :  { %v4019_v47 = vsel %vm139_vm3, %v3767_v2, 0.0 }
0x11fe   :  { %v5002_v37 = vpop.f32.mrb[44].mxu1 }
0x11ff   :  { %v4027_v53 = vsel %vm139_vm3, %v5002_v37, 0.0  ;;  %v3848_v41 = vpop.f32.mrb[45].mxu1 }
0x1200   :  { %v4028_v50 = vadd.f32 %v4027_v53, %v4026_v39  ;;  %v4020_v52 = vsel %vm139_vm3, %v3848_v41, 0.0 }
0x1201   :  { %v4021_v54 = vadd.f32 %v4020_v52, %v4019_v47  ;;  %v4186_v47 = vld [vmem:[#allocation2 + $0x168] sm:$0xff]  ;;  %v4188_v52 = vld [vmem:[#allocation2 + $0x178] sm:$0xff] }
0x1202   :  { %v5007_v43 = vpop.f32.mrb[40].mxu0 }
0x1203   :  { %v4029_v42 = vsel %vm139_vm3, %v5007_v43, 0.0  ;;  %v3929_v49 = vpop.f32.mrb[41].mxu0  ;;  %v4189_v43 = vld [vmem:[#allocation2 + $0x180] sm:$0xff] }
0x1204   :  { %v4030_v45 = vadd.f32 %v4029_v42, %v4028_v50  ;;  %v4022_v56 = vsel %vm139_vm3, %v3929_v49, 0.0  ;;  %v4187_v50 = vld [vmem:[#allocation2 + $0x170] sm:$0xff]  ;;  %v5133_v42 = vpack.c.bf16 %v4189_v43, %v4188_v52  ;;  %v4190_v49 = vld [vmem:[#allocation2 + $0x188] sm:$0xff]  ;;  %v4322_v52 = vld [vmem:[#allocation2 + $0x1c0] sm:$0xff] }
0x1205   :  { %v4023_v57 = vadd.f32 %v4022_v56, %v4021_v54  ;;  %v5129_v54 = vpack.c.bf16 %v4187_v50, %v4186_v47  ;;  %v5302_v47 = vmov 0.0|0.0  }
0x1207   :  { %v5012_v40 = vpop.f32.mrb[46].mxu1  ;;  %5130 = vmatprep.subr.bf16.mxu1 %v5129_v54 }
0x1208   :  { %v4031_v63 = vsel %vm139_vm3, %v5012_v40, 0.0  ;;  %v4010_v1 = vpop.f32.mrb[47].mxu1  ;;  %5132 = vmatpush3.bf16.msra.mxu1 %v5129_v54  ;;  %v4193_v40 = vld [vmem:[#allocation2 + $0x1a0] sm:$0xff] }
0x1209   :  { %v4032_v38 = vadd.f32 %v4031_v63, %v4030_v45  ;;  %v4024_v48 = vsel %vm139_vm3, %v4010_v1, 0.0  ;;  %v4191_v45 = vld [vmem:[#allocation2 + $0x190] sm:$0xff]  ;;  %5134 = vmatprep.subr.bf16.mxu1 %v5133_v42  ;;  %v4086_v63 = vrot.slane %v5633_v36, %v2034_v28 }
0x120a   :  { %v4025_v44 = vadd.f32 %v4024_v48, %v4023_v57  ;;  %v5137_v56 = vpack.c.bf16 %v4191_v45, %v4190_v49  ;;  %v4192_v57 = vld [vmem:[#allocation2 + $0x198] sm:$0xff] }
0x120b   :  { %v4038_v61 = vadd.f32 %v4036_v60, %v4032_v38 }
0x120c   :  { %v4037_v62 = vadd.f32 %v4036_v60, %v4025_v44  ;;  %5136 = vmatpush3.bf16.msra.mxu1 %v5133_v42  ;;  %v5141_v60 = vpack.c.bf16 %v4193_v40, %v4192_v57  ;;  %v4310_v40 = vrot.slane %v5633_v36, %v2258_v30  ;;  %v4323_v30 = vld [vmem:[#allocation2 + $0x1c8] sm:$0xff] }
0x120d   :  { %v4040_v0 = vadd.f32 %v4038_v61, %v5625_v35  ;;  %5138 = vmatprep.subr.bf16.mxu1 %v5137_v56 }
0x120e   :  { %v4039_v3 = vadd.f32 %v4037_v62, %v5623_v34  ;;  %v4079_v34 = vld [vmem:[#allocation2 + $0x148] sm:$0xff] }
0x120f   :  { %v4044_v4 = vsel %vm139_vm3, %v4040_v0, 0.0  ;;  %v5121_v24 = vpack.c.bf16 %v4080_v23, %v4079_v34  ;;  %v4197_v23 = vrot.slane %v5633_v36, %v2145_v46 }
0x1210   :  { %4045 = vadd.xlane.f32.xlu1 %v4044_v4  ;;  %v4041_v6 = vsel %vm139_vm3, %v4039_v3, 0.0  ;;  %5140 = vmatpush3.bf16.msra.mxu1 %v5137_v56 }
0x1211   :  { %4042 = vadd.xlane.f32.xlu0 %v4041_v6  ;;  %5122 = vmatprep.subr.bf16.mxu0 %v5121_v24 }
0x1212   :  { %5124 = vmatpush3.bf16.msra.mxu0 %v5121_v24  ;;  %5142 = vmatprep.subr.bf16.mxu1 %v5141_v60 }
0x1213   :  { %5126 = vmatprep.subr.bf16.mxu0 %v5125_v13 }
0x1214   :  { %5144 = vmatpush3.bf16.msra.mxu1 %v5141_v60 }
0x1216   :  { %5128 = vmatpush3.bf16.msra.mxu0 %v5125_v13 }
0x1217   :  { %5145 = vmatprep.subr.bf16.mxu0 %v5302_v47 }
0x129d   :  { %v4046_v55 = vpop.xlane.xlu1 %4045 }
0x129e   :  { %v4048_v9 = vmul.f32 0.03125, %v4046_v55  ;;  %v4043_v18 = vpop.xlane.xlu0 %4042 }
0x129f   :  { %v4047_v19 = vmul.f32 0.03125, %v4043_v18 }
0x12a0   :  { %v4050_v17 = vsub.f32 %v4040_v0, %v4048_v9 }
0x12a1   :  { %v4049_v8 = vsub.f32 %v4039_v3, %v4047_v19 }
0x12a2   :  { %v4052_v22 = vmul.f32 %v4050_v17, %v4050_v17 }
0x12a3   :  { %v4051_v20 = vmul.f32 %v4049_v8, %v4049_v8 }
0x12a4   :  { %v4056_v35 = vsel %vm139_vm3, %v4052_v22, 0.0 }
0x12a5   :  { %v4053_v21 = vsel %vm139_vm3, %v4051_v20, 0.0 }
0x12a6   :  { %4054 = vadd.xlane.f32.xlu0 %v4053_v21 }
0x12aa   :  { %4057 = vadd.xlane.f32.xlu0 %v4056_v35 }
0x1333   :  { %v4055_v16 = vpop.xlane.xlu0 %4054 }
0x1334   :  { %v4059_v27 = vmul.f32 0.03125, %v4055_v16 }
0x1336   :  { %v4061_v29 = vadd.f32 1e-12, %v4059_v27 }
0x1337   :  { %v4058_v7 = vpop.xlane.xlu0 %4057 }
0x1338   :  { %5251 = vrsqrt.f32 %v4061_v29  ;;  %v4060_v32 = vmul.f32 0.03125, %v4058_v7 }
0x133a   :  { %v4062_v11 = vadd.f32 1e-12, %v4060_v32 }
0x133c   :  { %5253 = vrsqrt.f32 %v4062_v11 }
0x1342   :  { %v5252_v14 = vpop.eup %5251 }
0x1343   :  { %v4065_v5 = vmul.f32 %v5252_v14, %v4049_v8 }
0x1345   :  { %v4071_v33 = vmul.f32 %v4070_v10, %v4065_v5 }
0x1346   :  { %v5254_v2 = vpop.eup %5253 }
0x1347   :  { %v4066_v37 = vmul.f32 %v5254_v2, %v4050_v17  ;;  %v4077_v39 = vadd.f32 %v4076_v12, %v4071_v33 }
0x1349   :  { %v4072_v53 = vmul.f32 %v4070_v10, %v4066_v37  ;;  %5021 = vmatprep.mubr.msk.f32.mxu0 %vm139_vm3, %v4077_v39 }
0x134b   :  { %v4078_v41 = vadd.f32 %v4076_v12, %v4072_v53  ;;  %v4320_v53 = vld [vmem:[#allocation2 + $0x1b0] sm:$0xff] }
0x134d   :  { %5022 = vmatmul.mubr.msk.f32.vlgmr.msra.gmra.mrb[42].mxu0 %vm139_vm3, %v4078_v41 }
0x134e   :  { %5051 = vmatprep.mubr.msk.f32.mxu0 %vm5298_vm4, %v5294_v15 }
0x1420   :  { %v5023_v1 = vpop.f32.mrb[42].mxu0 }
0x1421   :  { %v4165_v38 = vadd.f32 %v5023_v1, %v4086_v63  ;;  %v4159_v48 = vpop.f32.mrb[43].mxu0 }
0x1422   :  { %v4160_v44 = vadd.f32 %v4159_v48, %v4086_v63 }
0x1423   :  { %v4171_v61 = vmul.f32 0.044715, %v4165_v38  ;;  %v4169_v22 = vmul.f32 0.5, %v4165_v38 }
0x1424   :  { %v4170_v62 = vmul.f32 0.044715, %v4160_v44  ;;  %v4168_v28 = vmul.f32 0.5, %v4160_v44 }
0x1425   :  { %v4173_v0 = vmul.f32 %v4171_v61, %v4165_v38 }
0x1426   :  { %v4172_v3 = vmul.f32 %v4170_v62, %v4160_v44 }
0x1427   :  { %v4175_v4 = vmul.f32 %v4173_v0, %v4165_v38 }
0x1428   :  { %v4174_v6 = vmul.f32 %v4172_v3, %v4160_v44 }
0x1429   :  { %v4177_v55 = vadd.f32 %v4175_v4, %v4165_v38  ;;  %v4316_v38 = vrot.slane %v5633_v36, %v2264_v31  ;;  %v5265_v36 = vld [vmem:[#allocation2 + $0x10] sm:$0xff] }
0x142a   :  { %v4176_v9 = vadd.f32 %v4174_v6, %v4160_v44  ;;  %v4324_v6 = vld [vmem:[#allocation2 + $0x1d0] sm:$0xff] }
0x142b   :  { %v4179_v18 = vmul.f32 0.7978846, %v4177_v55  ;;  %v4325_v55 = vld [vmem:[#allocation2 + $0x1d8] sm:$0xff] }
0x142c   :  { %v4178_v19 = vmul.f32 0.7978846, %v4176_v9  ;;  %v5152_v9 = vpack.c.bf16 %v4324_v6, %v4323_v30  ;;  %v5155_v31 = vpack.c.bf16 %v4326_v51, %v4325_v55 }
0x142d   :  { %5255 = vtanh.f32 %v4179_v18  ;;  %v4330_v18 = vrot.slane %v5265_v36, %v5586_v58 }
0x142e   :  { %5257 = vtanh.f32 %v4178_v19 }
0x1437   :  { %v5256_v17 = vpop.eup %5255 }
0x1438   :  { %v5258_v8 = vpop.eup %5257  ;;  %v4183_v20 = vadd.f32 1.0, %v5256_v17 }
0x1439   :  { %v4182_v21 = vadd.f32 1.0, %v5258_v8 }
0x143a   :  { %v4185_v34 = vmul.f32 %v4183_v20, %v4169_v22 }
0x143b   :  { %v4184_v35 = vmul.f32 %v4182_v21, %v4168_v28 }
0x143d   :  { %5040 = vmatprep.mubr.msk.f32.mxu1 %vm57_vm0, %v4184_v35 }
0x143e   :  { %5041 = vmatmul.mubr.msk.f32.vlgmr.msra.gmra.mrb[48].mxu1 %vm57_vm0, %v4185_v34 }
0x1511   :  { %v5042_v24 = vpop.f32.mrb[48].mxu1 }
0x1512   :  { %v4276_v25 = vadd.f32 %v5042_v24, %v4197_v23  ;;  %v4270_v26 = vpop.f32.mrb[49].mxu1 }
0x1513   :  { %v4271_v13 = vadd.f32 %v4270_v26, %v4197_v23 }
0x1514   :  { %v4280_v16 = vadd.f32 %v4276_v25, %v4078_v41  ;;  %v4321_v41 = vld [vmem:[#allocation2 + $0x1b8] sm:$0xff]  ;;  %v4420_v25 = vrot.slane %v5265_v36, %v5589_v59 }
0x1515   :  { %v4279_v27 = vadd.f32 %v4271_v13, %v4077_v39  ;;  %v4319_v39 = vld [vmem:[#allocation2 + $0x1a8] sm:$0xff]  ;;  %v5149_v54 = vpack.c.bf16 %v4322_v52, %v4321_v41 }
0x1516   :  { %v4284_v29 = vsel %vm139_vm3, %v4280_v16, 0.0  ;;  %v5146_v50 = vpack.c.bf16 %v4320_v53, %v4319_v39 }
0x1517   :  { %4285 = vadd.xlane.f32.xlu1 %v4284_v29  ;;  %v4281_v7 = vsel %vm139_vm3, %v4279_v27, 0.0 }
0x1518   :  { %4282 = vadd.xlane.f32.xlu0 %v4281_v7  ;;  %5147 = vmatpush3.bf16.msra.mxu0 %v5146_v50 }
0x1519   :  { %5148 = vmatprep.subr.bf16.mxu0 %v5302_v47 }
0x151c   :  { %5150 = vmatpush3.bf16.msra.mxu0 %v5149_v54 }
0x151d   :  { %5151 = vmatprep.subr.bf16.mxu0 %v5302_v47 }
0x15a4   :  { %v4286_v32 = vpop.xlane.xlu1 %4285 }
0x15a5   :  { %v4288_v11 = vmul.f32 0.03125, %v4286_v32  ;;  %v4283_v10 = vpop.xlane.xlu0 %4282 }
0x15a6   :  { %v4287_v14 = vmul.f32 0.03125, %v4283_v10 }
0x15a7   :  { %v4290_v5 = vsub.f32 %v4280_v16, %v4288_v11 }
0x15a8   :  { %v4289_v12 = vsub.f32 %v4279_v27, %v4287_v14 }
0x15a9   :  { %v4292_v33 = vmul.f32 %v4290_v5, %v4290_v5 }
0x15aa   :  { %v4291_v46 = vmul.f32 %v4289_v12, %v4289_v12 }
0x15ab   :  { %v4296_v2 = vsel %vm139_vm3, %v4292_v33, 0.0 }
0x15ac   :  { %4297 = vadd.xlane.f32.xlu1 %v4296_v2  ;;  %v4293_v37 = vsel %vm139_vm3, %v4291_v46, 0.0 }
0x15ad   :  { %4294 = vadd.xlane.f32.xlu0 %v4293_v37 }
0x1639   :  { %v4298_v43 = vpop.xlane.xlu1 %4297 }
0x163a   :  { %v4300_v42 = vmul.f32 0.03125, %v4298_v43  ;;  %v4295_v49 = vpop.xlane.xlu0 %4294 }
0x163b   :  { %v4299_v45 = vmul.f32 0.03125, %v4295_v49 }
0x163c   :  { %v4302_v56 = vadd.f32 1e-12, %v4300_v42 }
0x163d   :  { %v4301_v57 = vadd.f32 1e-12, %v4299_v45 }
0x163e   :  { %5259 = vrsqrt.f32 %v4302_v56 }
0x163f   :  { %5261 = vrsqrt.f32 %v4301_v57 }
0x1648   :  { %v5260_v60 = vpop.eup %5259 }
0x1649   :  { %v5262_v63 = vpop.eup %5261  ;;  %v4306_v1 = vmul.f32 %v5260_v60, %v4290_v5 }
0x164a   :  { %v4305_v48 = vmul.f32 %v5262_v63, %v4289_v12 }
0x164b   :  { %v4312_v44 = vmul.f32 %v4310_v40, %v4306_v1 }
0x164c   :  { %v4311_v61 = vmul.f32 %v4310_v40, %v4305_v48 }
0x164d   :  { %v4318_v62 = vadd.f32 %v4316_v38, %v4312_v44 }
0x164e   :  { %v4317_v0 = vadd.f32 %v4316_v38, %v4311_v61 }
0x164f   :  { %v4333_v3 = vrot.slane %v4318_v62, 7 }
0x1651   :  { %v4335_v4 = vsel %vm4334_vm6, %v4333_v3, %v4317_v0 }
0x1652   :  { %5052 = vmatmul.mubr.msk.f32.vlgmr.msra.gmra.mrb[44].mxu0 %vm139_vm3, %v4335_v4 }
0x1653   :  { %5062 = vmatprep.mubr.msk.f32.mxu0 %vm5298_vm4, %v5294_v15  ;;  %5153 = vmatpush3.bf16.msra.mxu0 %v5152_v9 }
0x1654   :  { %5154 = vmatprep.subr.bf16.mxu0 %v5302_v47 }
0x1657   :  { %5156 = vmatpush3.bf16.msra.mxu0 %v5155_v31 }
0x1725   :  { %v4404_v19 = vpop.f32.mrb[44].mxu0 }
0x1726   :  { %v4405_v17 = vadd.f32 %v4404_v19, %v4330_v18  ;;  %v5053_v8 = vpop.f32.mrb[45].mxu0 }
0x1728   :  { %v4409_v20 = vmul.f32 0.044715, %v4405_v17  ;;  %v4408_v34 = vmul.f32 0.5, %v4405_v17 }
0x172a   :  { %v4410_v28 = vmul.f32 %v4409_v20, %v4405_v17 }
0x172c   :  { %v4411_v21 = vmul.f32 %v4410_v28, %v4405_v17 }
0x172e   :  { %v4412_v22 = vadd.f32 %v4411_v21, %v4405_v17 }
0x1730   :  { %v4413_v15 = vmul.f32 0.7978846, %v4412_v22 }
0x1732   :  { %5263 = vtanh.f32 %v4413_v15 }
0x173c   :  { %v5264_v35 = vpop.eup %5263 }
0x173d   :  { %v4415_v23 = vadd.f32 1.0, %v5264_v35 }
0x173f   :  { %v4416_v24 = vmul.f32 %v4415_v23, %v4408_v34 }
0x1741   :  { %5063 = vmatmul.mubr.msk.f32.vlgmr.msra.gmra.mrb[46].mxu0 %vm139_vm3, %v4416_v24 }
0x1814   :  { %v4490_v26 = vpop.f32.mrb[46].mxu0 }
0x1815   :  { %v4491_v13 = vadd.f32 %v4490_v26, %v4420_v25  ;;  %v5064_v58 = vpop.f32.mrb[47].mxu0 }
0x1817   :  { %v4494_v16 = vmax.f32 %v4491_v13, 0.0  ;;  %v4496_v27 = vrot.slane %v4491_v13, 6 }
0x1819   :  { %v4499_v29 = vsel %vm4498_vm7, %v4494_v16, %v4496_v27 }
0x181a   :  { %v4501_v7 = vsel %vm4500_vm8, %v4499_v29, 0.0 }
0x181b   :  { %4502 = vst [vmem:[%s5869_s3] sm:$0xff] %v4501_v7 }
0x181c   :  { %4507 = vsyncpa [#allocation3], 1 }

</bundles_post_ra>
